<compile_context>
chip_gen: v6e
topology: v6e:2x2x1
jax: 0.10.0
libtpu: 0.0.40
codegen_flags: <defaults>
</compile_context>

<pallas_src>
import jax
import jax.numpy as jnp
from jax.experimental import pallas as pl
from jax.experimental.pallas import tpu as pltpu


def mlp_v_kernel(x_ref, w1_ref, w2_ref, w3_ref, o_ref):
    # Cast to bf16 in-kernel (free under the x DMA) -> native MXU rate, f32 accumulation.
    x = x_ref[...].astype(jnp.bfloat16)

    # fc1 + ReLU : (tile_b, 2048)bf16 @ (2048, 256)bf16 -> (tile_b, 256)f32
    h1 = jnp.dot(x, w1_ref[...], preferred_element_type=jnp.float32)
    h1 = jnp.maximum(h1, 0.0)

    # fc4 + ReLU : (tile_b, 256)bf16 @ (256, 64)bf16 -> (tile_b, 64)f32
    h2 = jnp.dot(h1.astype(jnp.bfloat16), w2_ref[...],
                 preferred_element_type=jnp.float32)
    h2 = jnp.maximum(h2, 0.0)

    # fc6 (N=1) off the MXU: elementwise multiply with the (1, 64) weight row and a
    # cross-lane reduce, accumulated in f32.
    out = jnp.sum(h2 * w3_ref[...], axis=-1)          # (tile_b,)

    # Lane-dense store: one (1, tile_b) row per grid step.
    o_ref[...] = out[None, :].astype(o_ref.dtype)


def _round_up(a, m):
    return -(-a // m) * m


def mlp_v_forward(x, w1_t, w2_t, w3_row, *, tile_b_max=1024):
    """x: (B, 2048) f32/bf16.  w1_t: (2048, 256), w2_t: (256, 64), w3_row: (1, 64)."""
    B, D_in = x.shape
    assert D_in == w1_t.shape[0] == 2048
    assert w2_t.shape == (256, 64) and w3_row.shape == (1, 64)
    assert tile_b_max % 128 == 0, "keep M tiles 128-aligned for the MXU"

    # Small-B friendly tile choice; ragged last tile handled by the cdiv grid.
    tile_b = min(tile_b_max, _round_up(B, 128))
    num_tiles = pl.cdiv(B, tile_b)
    B_pad = num_tiles * tile_b

    # Weights are tiny -> pre-cast once (negligible HBM traffic); x is NOT touched here.
    w1_b = w1_t.astype(jnp.bfloat16)
    w2_b = w2_t.astype(jnp.bfloat16)
    w3_f = w3_row.astype(jnp.float32)   # stays f32 for the VPU reduce

    # Explicit VMEM budget: x tiles stay in their incoming dtype (f32 in the demo), so
    # tile_b=1024 needs ~22-26 MiB, above v5e's 16 MiB scoped default but comfortably
    # below v7x's 64 MiB physical VMEM.
    x_item = jnp.dtype(x.dtype).itemsize
    vmem_est = (
        2 * tile_b * D_in * x_item                                   # x tile, 2 buffers
        + 2 * (w1_b.size * 2 + w2_b.size * 2 + w3_f.size * 4)        # weights, 2 buffers
        + 2 * tile_b * 4                                             # output row, 2 buffers
        + tile_b * D_in * 2                                          # in-kernel bf16 x copy
        + tile_b * (256 + 64) * 6                                    # h1/h2 f32 + bf16
        + (4 << 20)                                                  # compiler scratch slack
    )
    vmem_limit = int(min(max(vmem_est, 32 << 20), 56 << 20))

    out2d = pl.pallas_call(
        mlp_v_kernel,
        out_shape=jax.ShapeDtypeStruct((1, B_pad), jnp.float32),
        grid_spec=pltpu.PrefetchScalarGridSpec(
            num_scalar_prefetch=0,
            grid=(num_tiles,),
            in_specs=[
                # activations: tiled along batch (last tile may be ragged)
                pl.BlockSpec((tile_b, D_in), lambda i: (i, 0)),
                # weights: full blocks, constant index -> resident across grid steps
                pl.BlockSpec(w1_b.shape, lambda i: (0, 0)),
                pl.BlockSpec(w2_b.shape, lambda i: (0, 0)),
                pl.BlockSpec(w3_f.shape, lambda i: (0, 0)),
            ],
            # strictly conformant, lane-dense output: (1, tile_b) slab per step
            out_specs=pl.BlockSpec((1, tile_b), lambda i: (0, i)),
        ),
        compiler_params=pltpu.CompilerParams(
            dimension_semantics=("parallel",),
            vmem_limit_bytes=vmem_limit,
        ),
    )(x, w1_b, w2_b, w3_f)

    # (1, B_pad) -> (B, 1), dropping the ragged-tile garbage rows.
    return out2d[0, :B].reshape(B, 1)


def init_params(key):
    # Mimic nn.Linear default init: uniform(-1/sqrt(fan_in), 1/sqrt(fan_in)), no bias.
    k1, k2, k3 = jax.random.split(key, 3)

    def lin(k, fan_in, fan_out):
        bound = 1.0 / jnp.sqrt(fan_in)
        # PyTorch stores (out, in).
        return jax.random.uniform(k, (fan_out, fan_in), jnp.float32, -bound, bound)

    w1 = lin(k1, 2048, 256)   # (256, 2048)
    w2 = lin(k2, 256, 64)     # (64, 256)
    w3 = lin(k3, 64, 1)       # (1, 64)
    # Kernel wants (in, out) for the two MXU layers; fc6 stays as its (1, 64) row.
    return w1.T, w2.T, w3


if __name__ == "__main__":
    key = jax.random.PRNGKey(0)
    kx, kp = jax.random.split(key)

    B = 8  # small demo batch (one ragged 128-row tile internally)
    x = jax.random.normal(kx, (B, 2048), jnp.float32)
    w1_t, w2_t, w3_row = init_params(kp)

    out = mlp_v_forward(x, w1_t, w2_t, w3_row)
    out = jax.block_until_ready(out)

    # Pure-JAX f32 reference (kernel uses bf16 matmul inputs + f32 accumulation,
    # so tolerance is loosened accordingly).
    ref = jnp.maximum(x @ w1_t, 0.0)
    ref = jnp.maximum(ref @ w2_t, 0.0)
    ref = ref @ w3_row.T

    assert out.shape == (B, 1)
    assert jnp.allclose(out, ref, atol=2e-2, rtol=2e-2), "mismatch vs reference"

    print("KERNEL_OK")
</pallas_src>

<mosaic_0001>
module attributes {stable_mosaic.version = 11 : i64} {
  func.func @mlp_v_kernel(%arg0: i32, %arg1: memref<128x2048xf32, #tpu.memory_space<vmem>>, %arg2: memref<2048x256xbf16, #tpu.memory_space<vmem>>, %arg3: memref<256x64xbf16, #tpu.memory_space<vmem>>, %arg4: memref<1x64xf32, #tpu.memory_space<vmem>>, %arg5: memref<1x128xf32, #tpu.memory_space<vmem>>) attributes {dimension_semantics = [#tpu.dimension_semantics<parallel>], iteration_bounds = array<i64: 1>, scalar_prefetch = 0 : i64, scratch_operands = 0 : i64, tpu.core_type = #tpu.core_type<tc>, window_params = [{transform_indices = @transform_0, window_bounds = array<i64: 128, 2048>}, {pipeline_mode = #tpu.pipeline_mode<synchronous>, transform_indices = @transform_1, window_bounds = array<i64: 2048, 256>}, {pipeline_mode = #tpu.pipeline_mode<synchronous>, transform_indices = @transform_2, window_bounds = array<i64: 256, 64>}, {pipeline_mode = #tpu.pipeline_mode<synchronous>, transform_indices = @transform_3, window_bounds = array<i64: 1, 64>}, {transform_indices = @transform_4, window_bounds = array<i64: 1, 128>}]} {
    %c0 = arith.constant 0 : index
    %c0_0 = arith.constant 0 : index
    %0 = vector.load %arg1[%c0, %c0_0] : memref<128x2048xf32, #tpu.memory_space<vmem>>, vector<128x2048xf32>
    %1 = arith.truncf %0 : vector<128x2048xf32> to vector<128x2048xbf16>
    %c0_1 = arith.constant 0 : index
    %c0_2 = arith.constant 0 : index
    %2 = vector.load %arg2[%c0_1, %c0_2] : memref<2048x256xbf16, #tpu.memory_space<vmem>>, vector<2048x256xbf16>
    %cst = arith.constant dense<0.000000e+00> : vector<128x256xf32>
    %3 = tpu.matmul %1, %2, %cst {dimension_numbers = #tpu.dot_dimension_numbers<[1], [0], [0], [1], [0, 0, 1, 1], [], []>} : vector<128x2048xbf16>, vector<2048x256xbf16>, vector<128x256xf32> -> vector<128x256xf32>
    %cst_3 = arith.constant 0.000000e+00 : f32
    %4 = vector.broadcast %cst_3 : f32 to vector<128x256xf32>
    %5 = arith.maximumf %3, %4 : vector<128x256xf32>
    %6 = arith.truncf %5 : vector<128x256xf32> to vector<128x256xbf16>
    %c0_4 = arith.constant 0 : index
    %c0_5 = arith.constant 0 : index
    %7 = vector.load %arg3[%c0_4, %c0_5] : memref<256x64xbf16, #tpu.memory_space<vmem>>, vector<256x64xbf16>
    %cst_6 = arith.constant dense<0.000000e+00> : vector<128x64xf32>
    %8 = tpu.matmul %6, %7, %cst_6 {dimension_numbers = #tpu.dot_dimension_numbers<[1], [0], [0], [1], [0, 0, 1, 1], [], []>} : vector<128x256xbf16>, vector<256x64xbf16>, vector<128x64xf32> -> vector<128x64xf32>
    %cst_7 = arith.constant 0.000000e+00 : f32
    %9 = vector.broadcast %cst_7 : f32 to vector<128x64xf32>
    %10 = arith.maximumf %8, %9 : vector<128x64xf32>
    %c0_8 = arith.constant 0 : index
    %c0_9 = arith.constant 0 : index
    %11 = vector.load %arg4[%c0_8, %c0_9] : memref<1x64xf32, #tpu.memory_space<vmem>>, vector<1x64xf32>
    %12 = vector.broadcast %11 : vector<1x64xf32> to vector<128x64xf32>
    %13 = arith.mulf %10, %12 : vector<128x64xf32>
    %cst_10 = arith.constant dense<0.000000e+00> : vector<128xf32>
    %14 = vector.multi_reduction <add>, %13, %cst_10 [1] : vector<128x64xf32> to vector<128xf32>
    %15 = vector.shape_cast %14 : vector<128xf32> to vector<1x128xf32>
    %c0_11 = arith.constant 0 : index
    %c0_12 = arith.constant 0 : index
    %16 = vector.load %arg5[%c0_11, %c0_12] : memref<1x128xf32, #tpu.memory_space<vmem>>, vector<1x128xf32>
    tpu.vector_store %arg5[%c0_11, %c0_12], %15 {strides = array<i32>} : memref<1x128xf32, #tpu.memory_space<vmem>>, vector<1x128xf32>,
    return
  }
  func.func @transform_0(%arg0: i32) -> (i32, i32) {
    %c0_i32 = arith.constant 0 : i32
    %c0_i32_0 = arith.constant 0 : i32
    return %arg0, %c0_i32 : i32, i32
  }
  func.func @transform_1(%arg0: i32) -> (i32, i32) {
    %c0_i32 = arith.constant 0 : i32
    %c0_i32_0 = arith.constant 0 : i32
    %c0_i32_1 = arith.constant 0 : i32
    return %c0_i32, %c0_i32_0 : i32, i32
  }
  func.func @transform_2(%arg0: i32) -> (i32, i32) {
    %c0_i32 = arith.constant 0 : i32
    %c0_i32_0 = arith.constant 0 : i32
    %c0_i32_1 = arith.constant 0 : i32
    return %c0_i32, %c0_i32_0 : i32, i32
  }
  func.func @transform_3(%arg0: i32) -> (i32, i32) {
    %c0_i32 = arith.constant 0 : i32
    %c0_i32_0 = arith.constant 0 : i32
    %c0_i32_1 = arith.constant 0 : i32
    return %c0_i32, %c0_i32_0 : i32, i32
  }
  func.func @transform_4(%arg0: i32) -> (i32, i32) {
    %c0_i32 = arith.constant 0 : i32
    %c0_i32_0 = arith.constant 0 : i32
    return %c0_i32, %arg0 : i32, i32
  }
}

</mosaic_0001>

<bundles_post_ra>
// kernel: tpu_custom_call.1
= control target key start
LH: loop header
LB: loop body
LE: loop exit
PB: predicated region body
PF: predicated region fallthrough
CT: control target
= control target key end

     0   :  { %9 = vsyncpa [#allocation3], 0  ;;  %s5425_s0 = inlined_call_operand.vmem [shape: f32[8,2048], index: 0, kind: input, shape index: {}]   ;;  %s5426_s1 = inlined_call_operand.hbm [shape: bf16[2048,256], index: 1, kind: input, shape index: {}]   ;;  %s5427_s2 = inlined_call_operand.vmem [shape: bf16[256,64], index: 2, kind: input, shape index: {}]   ;;  %s5428_s3 = inlined_call_operand.vmem [shape: f32[1,64], index: 3, kind: input, shape index: {}]   ;;  %s5429_s4 = inlined_call_operand.hbm [shape: f32[1,128], index: 4, kind: output, shape index: {}]  }
   0x1   :  { %10 = vsyncpa [#allocation4], 0  ;;  %s4163_s15 = smov [#allocation2]  }
   0x2   :  { %s18_s16 = sshll.u32 %s4163_s15, 4  ;;  %s19_s16 = int_to_ptr.vmem [resolvable:$true] %s18_s16 }
   0x3   :  { %s4127_s17 = scalar_lea.vmem %s19_s16, 32768  ;;  %p4132_p1 = scmp.lt.s32.totalorder %s19_s16, %s19_s16 }
   0x4   :  { %p4128_p0 = scmp.ne.s32.totalorder %s19_s16, %s4127_s17  ;;  %p4133_p2 = scmp.lt.s32.totalorder %s4127_s17, %s4127_s17 }
   0x6   :  { %p4134_p3 = por %p4133_p2, %p4132_p1 }
   0x8   :  { %p4135_p4 = pnand %p4134_p3, %p4128_p0 }
   0xa   :  { %4138 = shalt.err (!%p4135_p4)
}
   0xb   :  { %s4164_s18 = smov 128   ;;  %s4165_s19 = smov 8  }
   0xc   :  { %24 = dma.hbm_to_vmem [thread:$0]  %s5426_s1, 32768, %s19_s16, [#allocation3], %s4164_s18, %s4164_s18, %s4165_s19  }
   0xd   :  { %4159 = dma.done.wait [#allocation3], 32768  }
   0xe   :  { %4160 = vsyncadd [#allocation3], 4294934528  ;;  %v3719_v0 = vld [vmem:[#allocation2 + $0x74] ss:$8 sps:$4 sm:$0xff]   ;;  %v3723_v2 = vld [vmem:[#allocation2 + $0x70] ss:$8 sps:$4 sm:$0xff]  }
   0xf   :  { %v3721_v1 = vld [vmem:[#allocation2 + $0x174] ss:$8 sps:$4 sm:$0xff]   ;;  %1953 = vmatprep.subr.bf16.mxu0 %v3719_v0  ;;  %v3724_v3 = vld [vmem:[#allocation2 + $0x170] ss:$8 sps:$4 sm:$0xff]   ;;  %v3725_v4 = vld [vmem:[#allocation2 + $0x64] ss:$8 sps:$4 sm:$0xff]  }
  0x10   :  { %2066 = vmatprep.subr.bf16.mxu1 %v3721_v1  ;;  %1954 = vmatpush1.bf16.msra.mxu0 %v3723_v2  ;;  %v3727_v5 = vld [vmem:[#allocation2 + $0x164] ss:$8 sps:$4 sm:$0xff]   ;;  %v3729_v6 = vld [vmem:[#allocation2 + $0x60] ss:$8 sps:$4 sm:$0xff]   ;;  %v3731_v8 = vld [vmem:[#allocation2 + $0x54] ss:$8 sps:$4 sm:$0xff]  }
  0x11   :  { %2067 = vmatpush1.bf16.msra.mxu1 %v3724_v3  ;;  %1955 = vmatprep.subr.bf16.mxu0 %v3725_v4  ;;  %v3730_v7 = vld [vmem:[#allocation2 + $0x160] ss:$8 sps:$4 sm:$0xff]   ;;  %v3733_v9 = vld [vmem:[#allocation2 + $0x154] ss:$8 sps:$4 sm:$0xff]   ;;  %v3735_v10 = vld [vmem:[#allocation2 + $0x50] ss:$8 sps:$4 sm:$0xff]  }
  0x12   :  { %2068 = vmatprep.subr.bf16.mxu1 %v3727_v5  ;;  %v3736_v11 = vld [vmem:[#allocation2 + $0x150] ss:$8 sps:$4 sm:$0xff]   ;;  %v3737_v12 = vld [vmem:[#allocation2 + $0x44] ss:$8 sps:$4 sm:$0xff]   ;;  %v3741_v14 = vld [vmem:[#allocation2 + $0x40] ss:$8 sps:$4 sm:$0xff]  }
  0x13   :  { %v3739_v13 = vld [vmem:[#allocation2 + $0x144] ss:$8 sps:$4 sm:$0xff]   ;;  %v3742_v15 = vld [vmem:[#allocation2 + $0x140] ss:$8 sps:$4 sm:$0xff]   ;;  %v3743_v16 = vld [vmem:[#allocation2 + $0x34] ss:$8 sps:$4 sm:$0xff]  }
  0x14   :  { %1956 = vmatpush1.bf16.msra.mxu0 %v3729_v6  ;;  %v3745_v17 = vld [vmem:[#allocation2 + $0x134] ss:$8 sps:$4 sm:$0xff]   ;;  %v3747_v18 = vld [vmem:[#allocation2 + $0x30] ss:$8 sps:$4 sm:$0xff]   ;;  %v3749_v20 = vld [vmem:[#allocation2 + $0x24] ss:$8 sps:$4 sm:$0xff]  }
  0x15   :  { %2069 = vmatpush1.bf16.msra.mxu1 %v3730_v7  ;;  %1957 = vmatprep.subr.bf16.mxu0 %v3731_v8  ;;  %v3748_v19 = vld [vmem:[#allocation2 + $0x130] ss:$8 sps:$4 sm:$0xff]   ;;  %v3751_v21 = vld [vmem:[#allocation2 + $0x124] ss:$8 sps:$4 sm:$0xff]   ;;  %v3753_v22 = vld [vmem:[#allocation2 + $0x20] ss:$8 sps:$4 sm:$0xff]  }
  0x16   :  { %2070 = vmatprep.subr.bf16.mxu1 %v3733_v9  ;;  %v3754_v23 = vld [vmem:[#allocation2 + $0x120] ss:$8 sps:$4 sm:$0xff]   ;;  %v3755_v24 = vld [vmem:[#allocation2 + $0x14] ss:$8 sps:$4 sm:$0xff]   ;;  %v3759_v26 = vld [vmem:[#allocation2 + $0x10] ss:$8 sps:$4 sm:$0xff]  }
  0x17   :  { %v3757_v25 = vld [vmem:[#allocation2 + $0x114] ss:$8 sps:$4 sm:$0xff]   ;;  %v3760_v27 = vld [vmem:[#allocation2 + $0x110] ss:$8 sps:$4 sm:$0xff]   ;;  %v3761_v28 = vld [vmem:[#allocation2 + $0x4] ss:$8 sps:$4 sm:$0xff]  }
  0x18   :  { %1958 = vmatpush1.bf16.msra.mxu0 %v3735_v10  ;;  %v3763_v29 = vld [vmem:[#allocation2 + $0x104] ss:$8 sps:$4 sm:$0xff]   ;;  %v3765_v30 = vld [vmem:[#allocation2] ss:$8 sps:$4 sm:$0xff]   ;;  %v3767_v32 = vld [vmem:[#allocation2 + $0xf4] ss:$8 sps:$4 sm:$0xff]  }
  0x19   :  { %2071 = vmatpush1.bf16.msra.mxu1 %v3736_v11  ;;  %1959 = vmatprep.subr.bf16.mxu0 %v3737_v12  ;;  %v3766_v31 = vld [vmem:[#allocation2 + $0x100] ss:$8 sps:$4 sm:$0xff]   ;;  %v3769_v33 = vld [vmem:[#allocation2 + $0x1f4] ss:$8 sps:$4 sm:$0xff]   ;;  %v3771_v34 = vld [vmem:[#allocation2 + $0xf0] ss:$8 sps:$4 sm:$0xff]  }
  0x1a   :  { %2072 = vmatprep.subr.bf16.mxu1 %v3739_v13  ;;  %v3772_v35 = vld [vmem:[#allocation2 + $0x1f0] ss:$8 sps:$4 sm:$0xff]   ;;  %v3773_v36 = vld [vmem:[#allocation2 + $0xe4] ss:$8 sps:$4 sm:$0xff]   ;;  %v3777_v38 = vld [vmem:[#allocation2 + $0xe0] ss:$8 sps:$4 sm:$0xff]  }
  0x1b   :  { %v3775_v37 = vld [vmem:[#allocation2 + $0x1e4] ss:$8 sps:$4 sm:$0xff]   ;;  %v3778_v39 = vld [vmem:[#allocation2 + $0x1e0] ss:$8 sps:$4 sm:$0xff]   ;;  %v3779_v40 = vld [vmem:[#allocation2 + $0xd4] ss:$8 sps:$4 sm:$0xff]  }
  0x1c   :  { %1960 = vmatpush1.bf16.msra.mxu0 %v3741_v14  ;;  %v3781_v41 = vld [vmem:[#allocation2 + $0x1d4] ss:$8 sps:$4 sm:$0xff]   ;;  %v3783_v42 = vld [vmem:[#allocation2 + $0xd0] ss:$8 sps:$4 sm:$0xff]   ;;  %v3785_v44 = vld [vmem:[#allocation2 + $0xc4] ss:$8 sps:$4 sm:$0xff]  }
  0x1d   :  { %2073 = vmatpush1.bf16.msra.mxu1 %v3742_v15  ;;  %1961 = vmatprep.subr.bf16.mxu0 %v3743_v16  ;;  %v3784_v43 = vld [vmem:[#allocation2 + $0x1d0] ss:$8 sps:$4 sm:$0xff]   ;;  %v3787_v45 = vld [vmem:[#allocation2 + $0x1c4] ss:$8 sps:$4 sm:$0xff]   ;;  %v3789_v50 = vld [vmem:[#allocation2 + $0xc0] ss:$8 sps:$4 sm:$0xff]  }
  0x1e   :  { %2074 = vmatprep.subr.bf16.mxu1 %v3745_v17  ;;  %v34_v46 = vld [vmem:[%s5425_s0 + $0x8] sm:$0xff]  ;;  %v36_v48 = vld [vmem:[%s5425_s0 + $0x18] sm:$0xff]  ;;  %v33_v6 = vld [vmem:[%s5425_s0] sm:$0xff]  ;;  %vm3169_vm0 = vcmask 523264   ;;  %vm3245_vm1 = vcmask 130112   ;;  %vm3252_vm2 = vcmask 195712  }
  0x1f   :  { %v50_v47 = vld [vmem:[%s5425_s0 + $0x88] sm:$0xff]  ;;  %v52_v49 = vld [vmem:[%s5425_s0 + $0x98] sm:$0xff]  ;;  %v49_v7 = vld [vmem:[%s5425_s0 + $0x80] sm:$0xff]  ;;  %vm3259_vm3 = vcmask 261312   ;;  %vm3266_vm4 = vcmask 326912   ;;  %vm3273_vm5 = vcmask 392512  }
  0x20   :  { %1962 = vmatpush1.bf16.msra.mxu0 %v3747_v18  ;;  %v3790_v51 = vld [vmem:[#allocation2 + $0x1c0] ss:$8 sps:$4 sm:$0xff]   ;;  %v3791_v52 = vld [vmem:[#allocation2 + $0xb4] ss:$8 sps:$4 sm:$0xff]   ;;  %v290_v53 = vpack.c.bf16 %v50_v47, %v34_v46  ;;  %v292_v54 = vpack.c.bf16 %v52_v49, %v36_v48  ;;  %v3795_v56 = vld [vmem:[#allocation2 + $0xb0] ss:$8 sps:$4 sm:$0xff]   ;;  %v289_v16 = vpack.c.bf16 %v49_v7, %v33_v6 }
  0x21   :  { %2075 = vmatpush1.bf16.msra.mxu1 %v3748_v19  ;;  %1963 = vmatprep.subr.bf16.mxu0 %v3749_v20  ;;  %v3793_v55 = vld [vmem:[#allocation2 + $0x1b4] ss:$8 sps:$4 sm:$0xff]   ;;  %v3796_v57 = vld [vmem:[#allocation2 + $0x1b0] ss:$8 sps:$4 sm:$0xff]   ;;  %v3797_v58 = vld [vmem:[#allocation2 + $0xa4] ss:$8 sps:$4 sm:$0xff]  }
  0x22   :  { %2076 = vmatprep.subr.bf16.mxu1 %v3751_v21  ;;  %1985 = vmatprep.mubr.bf16.mxu0 %v290_v53  ;;  %v3799_v59 = vld [vmem:[#allocation2 + $0x1a4] ss:$8 sps:$4 sm:$0xff]   ;;  %v3801_v60 = vld [vmem:[#allocation2 + $0xa0] ss:$8 sps:$4 sm:$0xff]   ;;  %v3803_v62 = vld [vmem:[#allocation2 + $0x94] ss:$8 sps:$4 sm:$0xff]  }
  0x23   :  { %2098 = vmatprep.mubr.bf16.mxu1 %v292_v54  ;;  %v3802_v61 = vld [vmem:[#allocation2 + $0x1a0] ss:$8 sps:$4 sm:$0xff]   ;;  %v3805_v63 = vld [vmem:[#allocation2 + $0x194] ss:$8 sps:$4 sm:$0xff]   ;;  %v3807_v0 = vld [vmem:[#allocation2 + $0x90] ss:$8 sps:$4 sm:$0xff]  }
  0x24   :  { %1964 = vmatpush1.bf16.msra.mxu0 %v3753_v22  ;;  %v3808_v1 = vld [vmem:[#allocation2 + $0x190] ss:$8 sps:$4 sm:$0xff]   ;;  %v3809_v2 = vld [vmem:[#allocation2 + $0x84] ss:$8 sps:$4 sm:$0xff]   ;;  %v3813_v4 = vld [vmem:[#allocation2 + $0x80] ss:$8 sps:$4 sm:$0xff]  }
  0x25   :  { %2077 = vmatpush1.bf16.msra.mxu1 %v3754_v23  ;;  %1965 = vmatprep.subr.bf16.mxu0 %v3755_v24  ;;  %v3811_v3 = vld [vmem:[#allocation2 + $0x184] ss:$8 sps:$4 sm:$0xff]   ;;  %v3814_v5 = vld [vmem:[#allocation2 + $0x180] ss:$8 sps:$4 sm:$0xff]   ;;  %v35_v8 = vld [vmem:[%s5425_s0 + $0x10] sm:$0xff]  ;;  %vm3280_vm6 = vcmask 458112  }
  0x26   :  { %2078 = vmatprep.subr.bf16.mxu1 %v3757_v25  ;;  %v51_v9 = vld [vmem:[%s5425_s0 + $0x90] sm:$0xff]  ;;  %v66_v14 = vld [vmem:[%s5425_s0 + $0x108] sm:$0xff]  ;;  %v68_v18 = vld [vmem:[%s5425_s0 + $0x118] sm:$0xff]  ;;  %vm3287_vm7 = vcmask 523712   ;;  %vm3294_vm8 = vcmask 589312   ;;  %vm3301_vm9 = vcmask 654912  }
  0x27   :  { %v3817_v10 = vld [vmem:[#allocation2 + $0x274] ss:$8 sps:$4 sm:$0xff]   ;;  %v3815_v12 = vld [vmem:[#allocation2 + $0x270] ss:$8 sps:$4 sm:$0xff]   ;;  %v82_v15 = vld [vmem:[%s5425_s0 + $0x188] sm:$0xff]  ;;  %v291_v17 = vpack.c.bf16 %v51_v9, %v35_v8  ;;  %vm3308_vm10 = vcmask 720512  }
  0x28   :  { %1966 = vmatpush1.bf16.msra.mxu0 %v3759_v26  ;;  %v3820_v11 = vld [vmem:[#allocation2 + $0x374] ss:$8 sps:$4 sm:$0xff]   ;;  %v3818_v13 = vld [vmem:[#allocation2 + $0x370] ss:$8 sps:$4 sm:$0xff]   ;;  %v3823_v20 = vld [vmem:[#allocation2 + $0x264] ss:$8 sps:$4 sm:$0xff]   ;;  %v306_v23 = vpack.c.bf16 %v82_v15, %v66_v14 }
  0x29   :  { %2079 = vmatpush1.bf16.msra.mxu1 %v3760_v27  ;;  %1967 = vmatprep.subr.bf16.mxu0 %v3761_v28  ;;  %v84_v19 = vld [vmem:[%s5425_s0 + $0x198] sm:$0xff]  ;;  %v3826_v21 = vld [vmem:[#allocation2 + $0x364] ss:$8 sps:$4 sm:$0xff]   ;;  %v3821_v22 = vld [vmem:[#allocation2 + $0x260] ss:$8 sps:$4 sm:$0xff]   ;;  %vm3315_vm11 = vcmask 786112  }
  0x2a   :  { %2080 = vmatprep.subr.bf16.mxu1 %v3763_v29  ;;  %v308_v24 = vpack.c.bf16 %v84_v19, %v68_v18  ;;  %v3824_v25 = vld [vmem:[#allocation2 + $0x360] ss:$8 sps:$4 sm:$0xff]   ;;  %v67_v28 = vld [vmem:[%s5425_s0 + $0x110] sm:$0xff]  ;;  %v164_v14 = vld [vmem:[%s5425_s0 + $0x418] sm:$0xff]  ;;  %vm3322_vm12 = vcmask 851712   ;;  %vm3329_vm13 = vcmask 917312  }
  0x2b   :  { %v65_v26 = vld [vmem:[%s5425_s0 + $0x100] sm:$0xff]  ;;  %v83_v29 = vld [vmem:[%s5425_s0 + $0x190] sm:$0xff]  ;;  %v130_v54 = vld [vmem:[%s5425_s0 + $0x308] sm:$0xff]  ;;  %vm3336_vm14 = vcmask 982912   ;;  %vm3343_vm15 = vcmask 1048512  }
  0x2c   :  { %1968 = vmatpush1.bf16.msra.mxu0 %v3765_v30  ;;  %v81_v27 = vld [vmem:[%s5425_s0 + $0x180] sm:$0xff]  ;;  %v3829_v30 = vld [vmem:[#allocation2 + $0x254] ss:$8 sps:$4 sm:$0xff]   ;;  %v3842_v53 = vld [vmem:[#allocation2 + $0x330] ss:$8 sps:$4 sm:$0xff]  }
  0x2d   :  { %2081 = vmatpush1.bf16.msra.mxu1 %v3766_v31  ;;  %1969 = vmatprep.subr.bf16.mxu0 %v3767_v32  ;;  %v3832_v31 = vld [vmem:[#allocation2 + $0x354] ss:$8 sps:$4 sm:$0xff]   ;;  %v3827_v32 = vld [vmem:[#allocation2 + $0x250] ss:$8 sps:$4 sm:$0xff]   ;;  %v97_v46 = vld [vmem:[%s5425_s0 + $0x200] sm:$0xff] }
  0x2e   :  { %2082 = vmatprep.subr.bf16.mxu1 %v3769_v33  ;;  %v3830_v33 = vld [vmem:[#allocation2 + $0x350] ss:$8 sps:$4 sm:$0xff]   ;;  %v113_v47 = vld [vmem:[%s5425_s0 + $0x280] sm:$0xff]  ;;  %v3853_v6 = vld [vmem:[#allocation2 + $0x214] ss:$8 sps:$4 sm:$0xff]  }
  0x2f   :  { %v99_v48 = vld [vmem:[%s5425_s0 + $0x210] sm:$0xff]  ;;  %v180_v15 = vld [vmem:[%s5425_s0 + $0x498] sm:$0xff]  ;;  %v3857_v18 = vld [vmem:[#allocation2 + $0x200] ss:$8 sps:$4 sm:$0xff]  }
  0x30   :  { %1970 = vmatpush2.bf16.msra.mxu0 %v3771_v34  ;;  %v98_v34 = vld [vmem:[%s5425_s0 + $0x208] sm:$0xff]  ;;  %v115_v49 = vld [vmem:[%s5425_s0 + $0x290] sm:$0xff] }
  0x31   :  { %2083 = vmatpush2.bf16.msra.mxu1 %v3772_v35  ;;  %1971 = vmatprep.subr.bf16.mxu0 %v3773_v36  ;;  %v114_v35 = vld [vmem:[%s5425_s0 + $0x288] sm:$0xff]  ;;  %v305_v36 = vpack.c.bf16 %v81_v27, %v65_v26  ;;  %v3856_v7 = vld [vmem:[#allocation2 + $0x314] ss:$8 sps:$4 sm:$0xff]   ;;  %v3851_v8 = vld [vmem:[#allocation2 + $0x210] ss:$8 sps:$4 sm:$0xff]  }
  0x32   :  { %2084 = vmatprep.subr.bf16.mxu1 %v3775_v37  ;;  %v307_v37 = vpack.c.bf16 %v83_v29, %v67_v28  ;;  %v3854_v9 = vld [vmem:[#allocation2 + $0x310] ss:$8 sps:$4 sm:$0xff]   ;;  %v3865_v26 = vld [vmem:[#allocation2 + $0x2f4] ss:$8 sps:$4 sm:$0xff]  }
  0x33   :  { %v3868_v27 = vld [vmem:[#allocation2 + $0x3f4] ss:$8 sps:$4 sm:$0xff]   ;;  %v3863_v28 = vld [vmem:[#allocation2 + $0x2f0] ss:$8 sps:$4 sm:$0xff]  }
  0x34   :  { %1972 = vmatpush2.bf16.msra.mxu0 %v3777_v38  ;;  %v100_v38 = vld [vmem:[%s5425_s0 + $0x218] sm:$0xff] }
  0x35   :  { %2085 = vmatpush2.bf16.msra.mxu1 %v3778_v39  ;;  %1973 = vmatprep.subr.bf16.mxu0 %v3779_v40  ;;  %v116_v39 = vld [vmem:[%s5425_s0 + $0x298] sm:$0xff]  ;;  %v3835_v40 = vld [vmem:[#allocation2 + $0x244] ss:$8 sps:$4 sm:$0xff]  }
  0x36   :  { %2086 = vmatprep.subr.bf16.mxu1 %v3781_v41  ;;  %v3838_v41 = vld [vmem:[#allocation2 + $0x344] ss:$8 sps:$4 sm:$0xff]   ;;  %v3866_v29 = vld [vmem:[#allocation2 + $0x3f0] ss:$8 sps:$4 sm:$0xff]  }
  0x38   :  { %1974 = vmatpush2.bf16.msra.mxu0 %v3783_v42  ;;  %v3833_v42 = vld [vmem:[#allocation2 + $0x240] ss:$8 sps:$4 sm:$0xff]  }
  0x39   :  { %2087 = vmatpush2.bf16.msra.mxu1 %v3784_v43  ;;  %1975 = vmatprep.subr.bf16.mxu0 %v3785_v44  ;;  %v322_v43 = vpack.c.bf16 %v114_v35, %v98_v34  ;;  %v324_v44 = vpack.c.bf16 %v116_v39, %v100_v38  ;;  %v196_v34 = vld [vmem:[%s5425_s0 + $0x518] sm:$0xff]  ;;  %v3869_v38 = vld [vmem:[#allocation2 + $0x2e0] ss:$8 sps:$4 sm:$0xff]  }
  0x3a   :  { %2088 = vmatprep.subr.bf16.mxu1 %v3787_v45  ;;  %v3836_v45 = vld [vmem:[#allocation2 + $0x340] ss:$8 sps:$4 sm:$0xff]   ;;  %v212_v35 = vld [vmem:[%s5425_s0 + $0x598] sm:$0xff] }
  0x3c   :  { %1976 = vmatpush2.bf16.msra.mxu0 %v3789_v50  ;;  %v3841_v50 = vld [vmem:[#allocation2 + $0x234] ss:$8 sps:$4 sm:$0xff]  }
  0x3d   :  { %2089 = vmatpush2.bf16.msra.mxu1 %v3790_v51  ;;  %1977 = vmatprep.subr.bf16.mxu0 %v3791_v52  ;;  %v3844_v51 = vld [vmem:[#allocation2 + $0x334] ss:$8 sps:$4 sm:$0xff]   ;;  %v3839_v52 = vld [vmem:[#allocation2 + $0x230] ss:$8 sps:$4 sm:$0xff]  }
  0x3e   :  { %2090 = vmatprep.subr.bf16.mxu1 %v3793_v55  ;;  %v146_v55 = vld [vmem:[%s5425_s0 + $0x388] sm:$0xff] }
  0x40   :  { %1978 = vmatpush2.bf16.msra.mxu0 %v3795_v56  ;;  %v321_v56 = vpack.c.bf16 %v113_v47, %v97_v46  ;;  %v3877_v46 = vld [vmem:[#allocation2 + $0x2d4] ss:$8 sps:$4 sm:$0xff]  }
  0x41   :  { %2091 = vmatpush2.bf16.msra.mxu1 %v3796_v57  ;;  %1979 = vmatprep.subr.bf16.mxu0 %v3797_v58  ;;  %v323_v57 = vpack.c.bf16 %v115_v49, %v99_v48  ;;  %v132_v58 = vld [vmem:[%s5425_s0 + $0x318] sm:$0xff] }
  0x42   :  { %2092 = vmatprep.subr.bf16.mxu1 %v3799_v59  ;;  %v148_v59 = vld [vmem:[%s5425_s0 + $0x398] sm:$0xff] }
  0x43   :  { %v3880_v47 = vld [vmem:[#allocation2 + $0x3d4] ss:$8 sps:$4 sm:$0xff]   ;;  %v3875_v48 = vld [vmem:[#allocation2 + $0x2d0] ss:$8 sps:$4 sm:$0xff]  }
  0x44   :  { %1980 = vmatpush2.bf16.msra.mxu0 %v3801_v60  ;;  %v3847_v60 = vld [vmem:[#allocation2 + $0x224] ss:$8 sps:$4 sm:$0xff]   ;;  %v3878_v49 = vld [vmem:[#allocation2 + $0x3d0] ss:$8 sps:$4 sm:$0xff]  }
  0x45   :  { %2093 = vmatpush2.bf16.msra.mxu1 %v3802_v61  ;;  %1981 = vmatprep.subr.bf16.mxu0 %v3803_v62  ;;  %v3850_v61 = vld [vmem:[#allocation2 + $0x324] ss:$8 sps:$4 sm:$0xff]   ;;  %v3845_v62 = vld [vmem:[#allocation2 + $0x220] ss:$8 sps:$4 sm:$0xff]  }
  0x46   :  { %2094 = vmatprep.subr.bf16.mxu1 %v3805_v63  ;;  %v338_v63 = vpack.c.bf16 %v146_v55, %v130_v54  ;;  %v228_v54 = vld [vmem:[%s5425_s0 + $0x618] sm:$0xff] }
  0x47   :  { %v244_v55 = vld [vmem:[%s5425_s0 + $0x698] sm:$0xff] }
  0x48   :  { %1982 = vmatpush2.bf16.msra.mxu0 %v3807_v0  ;;  %v340_v0 = vpack.c.bf16 %v148_v59, %v132_v58  ;;  %v3881_v58 = vld [vmem:[#allocation2 + $0x2c0] ss:$8 sps:$4 sm:$0xff]  }
  0x49   :  { %2095 = vmatpush2.bf16.msra.mxu1 %v3808_v1  ;;  %1983 = vmatprep.subr.bf16.mxu0 %v3809_v2  ;;  %v3848_v1 = vld [vmem:[#allocation2 + $0x320] ss:$8 sps:$4 sm:$0xff]  }
  0x4a   :  { %2096 = vmatprep.subr.bf16.mxu1 %v3811_v3  ;;  %v129_v2 = vld [vmem:[%s5425_s0 + $0x300] sm:$0xff] }
  0x4b   :  { %v145_v3 = vld [vmem:[%s5425_s0 + $0x380] sm:$0xff] }
  0x4c   :  { %1984 = vmatpush2.bf16.msra.mxu0 %v3813_v4  ;;  %v131_v4 = vld [vmem:[%s5425_s0 + $0x310] sm:$0xff] }
  0x4d   :  { %2097 = vmatpush2.bf16.msra.mxu1 %v3814_v5  ;;  %2179 = vmatprep.subr.bf16.mxu0 %v3817_v10  ;;  %v147_v5 = vld [vmem:[%s5425_s0 + $0x390] sm:$0xff]  ;;  %v162_v10 = vld [vmem:[%s5425_s0 + $0x408] sm:$0xff] }
  0x4e   :  { %2292 = vmatprep.subr.bf16.mxu1 %v3820_v11  ;;  %v178_v11 = vld [vmem:[%s5425_s0 + $0x488] sm:$0xff] }
  0x4f   :  { %1986 = vmatmul.mubr.bf16.vlgmr.msra.gmra.mxu0 %v289_v16  ;;  %v3859_v16 = vld [vmem:[#allocation2 + $0x204] ss:$8 sps:$4 sm:$0xff]   ;;  %v354_v19 = vpack.c.bf16 %v178_v11, %v162_v10  ;;  %v260_v10 = vld [vmem:[%s5425_s0 + $0x718] sm:$0xff] }
  0x50   :  { %2099 = vmatmul.mubr.bf16.vlgmr.msra.gmra.mxu1 %v291_v17  ;;  %2180 = vmatpush1.bf16.msra.mxu0 %v3815_v12  ;;  %v337_v12 = vpack.c.bf16 %v145_v3, %v129_v2  ;;  %v3862_v17 = vld [vmem:[#allocation2 + $0x304] ss:$8 sps:$4 sm:$0xff]   ;;  %v3889_v2 = vld [vmem:[#allocation2 + $0x2b4] ss:$8 sps:$4 sm:$0xff]  }
  0x51   :  { %2293 = vmatpush1.bf16.msra.mxu1 %v3818_v13  ;;  %2181 = vmatprep.subr.bf16.mxu0 %v3823_v20  ;;  %v339_v13 = vpack.c.bf16 %v147_v5, %v131_v4  ;;  %v356_v20 = vpack.c.bf16 %v180_v15, %v164_v14  ;;  %v3892_v3 = vld [vmem:[#allocation2 + $0x3b4] ss:$8 sps:$4 sm:$0xff]   ;;  %v3887_v4 = vld [vmem:[#allocation2 + $0x2b0] ss:$8 sps:$4 sm:$0xff]   ;;  %v3893_v14 = vld [vmem:[#allocation2 + $0x2a0] ss:$8 sps:$4 sm:$0xff]  }
  0x52   :  { %2294 = vmatprep.subr.bf16.mxu1 %v3826_v21  ;;  %1995 = vmatprep.mubr.bf16.mxu0 %v306_v23  ;;  %v3860_v21 = vld [vmem:[#allocation2 + $0x300] ss:$8 sps:$4 sm:$0xff]   ;;  %v3890_v5 = vld [vmem:[#allocation2 + $0x3b0] ss:$8 sps:$4 sm:$0xff]  }
  0x53   :  { %2108 = vmatprep.mubr.bf16.mxu1 %v308_v24  ;;  %v177_v23 = vld [vmem:[%s5425_s0 + $0x480] sm:$0xff]  ;;  %v163_v24 = vld [vmem:[%s5425_s0 + $0x410] sm:$0xff]  ;;  %v276_v11 = vld [vmem:[%s5425_s0 + $0x798] sm:$0xff] }
  0x54   :  { %2182 = vmatpush1.bf16.msra.mxu0 %v3821_v22  ;;  %v161_v22 = vld [vmem:[%s5425_s0 + $0x400] sm:$0xff] }
  0x55   :  { %2295 = vmatpush1.bf16.msra.mxu1 %v3824_v25  ;;  %2183 = vmatprep.subr.bf16.mxu0 %v3829_v30  ;;  %v179_v25 = vld [vmem:[%s5425_s0 + $0x490] sm:$0xff]  ;;  %v194_v30 = vld [vmem:[%s5425_s0 + $0x508] sm:$0xff] }
  0x56   :  { %2296 = vmatprep.subr.bf16.mxu1 %v3832_v31  ;;  %v210_v31 = vld [vmem:[%s5425_s0 + $0x588] sm:$0xff] }
  0x57   :  { %1996 = vmatmul.mubr.bf16.gmra.mxu0 %v305_v36  ;;  %v3871_v36 = vld [vmem:[#allocation2 + $0x2e4] ss:$8 sps:$4 sm:$0xff]   ;;  %v370_v39 = vpack.c.bf16 %v210_v31, %v194_v30  ;;  %v40_v30 = vld [vmem:[%s5425_s0 + $0x38] sm:$0xff] }
  0x58   :  { %2109 = vmatmul.mubr.bf16.gmra.mxu1 %v307_v37  ;;  %2184 = vmatpush1.bf16.msra.mxu0 %v3827_v32  ;;  %v353_v32 = vpack.c.bf16 %v177_v23, %v161_v22  ;;  %v3874_v37 = vld [vmem:[#allocation2 + $0x3e4] ss:$8 sps:$4 sm:$0xff]   ;;  %v3901_v22 = vld [vmem:[#allocation2 + $0x294] ss:$8 sps:$4 sm:$0xff]  }
  0x59   :  { %2297 = vmatpush1.bf16.msra.mxu1 %v3830_v33  ;;  %2185 = vmatprep.subr.bf16.mxu0 %v3835_v40  ;;  %v355_v33 = vpack.c.bf16 %v179_v25, %v163_v24  ;;  %v372_v40 = vpack.c.bf16 %v212_v35, %v196_v34  ;;  %v3904_v23 = vld [vmem:[#allocation2 + $0x394] ss:$8 sps:$4 sm:$0xff]   ;;  %v3899_v24 = vld [vmem:[#allocation2 + $0x290] ss:$8 sps:$4 sm:$0xff]   ;;  %v3905_v34 = vld [vmem:[#allocation2 + $0x280] ss:$8 sps:$4 sm:$0xff]  }
  0x5a   :  { %2298 = vmatprep.subr.bf16.mxu1 %v3838_v41  ;;  %2005 = vmatprep.mubr.bf16.mxu0 %v322_v43  ;;  %v3872_v41 = vld [vmem:[#allocation2 + $0x3e0] ss:$8 sps:$4 sm:$0xff]   ;;  %v3902_v25 = vld [vmem:[#allocation2 + $0x390] ss:$8 sps:$4 sm:$0xff]  }
  0x5b   :  { %2118 = vmatprep.mubr.bf16.mxu1 %v324_v44  ;;  %v209_v43 = vld [vmem:[%s5425_s0 + $0x580] sm:$0xff]  ;;  %v195_v44 = vld [vmem:[%s5425_s0 + $0x510] sm:$0xff]  ;;  %v56_v31 = vld [vmem:[%s5425_s0 + $0xb8] sm:$0xff] }
  0x5c   :  { %2186 = vmatpush1.bf16.msra.mxu0 %v3833_v42  ;;  %v193_v42 = vld [vmem:[%s5425_s0 + $0x500] sm:$0xff] }
  0x5d   :  { %2299 = vmatpush1.bf16.msra.mxu1 %v3836_v45  ;;  %2187 = vmatprep.subr.bf16.mxu0 %v3841_v50  ;;  %v211_v45 = vld [vmem:[%s5425_s0 + $0x590] sm:$0xff]  ;;  %v226_v50 = vld [vmem:[%s5425_s0 + $0x608] sm:$0xff] }
  0x5e   :  { %2300 = vmatprep.subr.bf16.mxu1 %v3844_v51  ;;  %v242_v51 = vld [vmem:[%s5425_s0 + $0x688] sm:$0xff] }
  0x5f   :  { %2006 = vmatmul.mubr.bf16.gmra.mxu0 %v321_v56  ;;  %v3883_v56 = vld [vmem:[#allocation2 + $0x2c4] ss:$8 sps:$4 sm:$0xff]   ;;  %v386_v59 = vpack.c.bf16 %v242_v51, %v226_v50  ;;  %v72_v50 = vld [vmem:[%s5425_s0 + $0x138] sm:$0xff] }
  0x60   :  { %2119 = vmatmul.mubr.bf16.gmra.mxu1 %v323_v57  ;;  %2188 = vmatpush1.bf16.msra.mxu0 %v3839_v52  ;;  %v369_v52 = vpack.c.bf16 %v209_v43, %v193_v42  ;;  %v3886_v57 = vld [vmem:[#allocation2 + $0x3c4] ss:$8 sps:$4 sm:$0xff]   ;;  %v3913_v42 = vld [vmem:[#allocation2 + $0x474] ss:$8 sps:$4 sm:$0xff]  }
  0x61   :  { %2301 = vmatpush1.bf16.msra.mxu1 %v3842_v53  ;;  %2189 = vmatprep.subr.bf16.mxu0 %v3847_v60  ;;  %v371_v53 = vpack.c.bf16 %v211_v45, %v195_v44  ;;  %v388_v60 = vpack.c.bf16 %v244_v55, %v228_v54  ;;  %v3916_v43 = vld [vmem:[#allocation2 + $0x574] ss:$8 sps:$4 sm:$0xff]   ;;  %v3911_v44 = vld [vmem:[#allocation2 + $0x470] ss:$8 sps:$4 sm:$0xff]   ;;  %v3917_v54 = vld [vmem:[#allocation2 + $0x460] ss:$8 sps:$4 sm:$0xff]  }
  0x62   :  { %2302 = vmatprep.subr.bf16.mxu1 %v3850_v61  ;;  %2015 = vmatprep.mubr.bf16.mxu0 %v338_v63  ;;  %v3884_v61 = vld [vmem:[#allocation2 + $0x3c0] ss:$8 sps:$4 sm:$0xff]   ;;  %v3914_v45 = vld [vmem:[#allocation2 + $0x570] ss:$8 sps:$4 sm:$0xff]  }
  0x63   :  { %2128 = vmatprep.mubr.bf16.mxu1 %v340_v0  ;;  %v241_v63 = vld [vmem:[%s5425_s0 + $0x680] sm:$0xff]  ;;  %v227_v0 = vld [vmem:[%s5425_s0 + $0x610] sm:$0xff]  ;;  %v88_v51 = vld [vmem:[%s5425_s0 + $0x1b8] sm:$0xff] }
  0x64   :  { %2190 = vmatpush1.bf16.msra.mxu0 %v3845_v62  ;;  %v225_v62 = vld [vmem:[%s5425_s0 + $0x600] sm:$0xff] }
  0x65   :  { %2303 = vmatpush1.bf16.msra.mxu1 %v3848_v1  ;;  %2191 = vmatprep.subr.bf16.mxu0 %v3853_v6  ;;  %v243_v1 = vld [vmem:[%s5425_s0 + $0x690] sm:$0xff]  ;;  %v258_v6 = vld [vmem:[%s5425_s0 + $0x708] sm:$0xff] }
  0x66   :  { %2304 = vmatprep.subr.bf16.mxu1 %v3856_v7  ;;  %v274_v7 = vld [vmem:[%s5425_s0 + $0x788] sm:$0xff] }
  0x67   :  { %2016 = vmatmul.mubr.bf16.gmra.mxu0 %v337_v12  ;;  %v3895_v12 = vld [vmem:[#allocation2 + $0x2a4] ss:$8 sps:$4 sm:$0xff]   ;;  %v402_v15 = vpack.c.bf16 %v274_v7, %v258_v6  ;;  %v104_v6 = vld [vmem:[%s5425_s0 + $0x238] sm:$0xff] }
  0x68   :  { %2129 = vmatmul.mubr.bf16.gmra.mxu1 %v339_v13  ;;  %2192 = vmatpush1.bf16.msra.mxu0 %v3851_v8  ;;  %v385_v8 = vpack.c.bf16 %v241_v63, %v225_v62  ;;  %v3898_v13 = vld [vmem:[#allocation2 + $0x3a4] ss:$8 sps:$4 sm:$0xff]   ;;  %v3925_v62 = vld [vmem:[#allocation2 + $0x454] ss:$8 sps:$4 sm:$0xff]  }
  0x69   :  { %2305 = vmatpush1.bf16.msra.mxu1 %v3854_v9  ;;  %2193 = vmatprep.subr.bf16.mxu0 %v3859_v16  ;;  %v387_v9 = vpack.c.bf16 %v243_v1, %v227_v0  ;;  %v404_v16 = vpack.c.bf16 %v276_v11, %v260_v10  ;;  %v3928_v63 = vld [vmem:[#allocation2 + $0x554] ss:$8 sps:$4 sm:$0xff]   ;;  %v3923_v0 = vld [vmem:[#allocation2 + $0x450] ss:$8 sps:$4 sm:$0xff]   ;;  %v3929_v10 = vld [vmem:[#allocation2 + $0x440] ss:$8 sps:$4 sm:$0xff]  }
  0x6a   :  { %2306 = vmatprep.subr.bf16.mxu1 %v3862_v17  ;;  %2025 = vmatprep.mubr.bf16.mxu0 %v354_v19  ;;  %v3896_v17 = vld [vmem:[#allocation2 + $0x3a0] ss:$8 sps:$4 sm:$0xff]   ;;  %v3926_v1 = vld [vmem:[#allocation2 + $0x550] ss:$8 sps:$4 sm:$0xff]  }
  0x6b   :  { %2138 = vmatprep.mubr.bf16.mxu1 %v356_v20  ;;  %v273_v19 = vld [vmem:[%s5425_s0 + $0x780] sm:$0xff]  ;;  %v259_v20 = vld [vmem:[%s5425_s0 + $0x710] sm:$0xff]  ;;  %v120_v7 = vld [vmem:[%s5425_s0 + $0x2b8] sm:$0xff] }
  0x6c   :  { %2194 = vmatpush1.bf16.msra.mxu0 %v3857_v18  ;;  %v257_v18 = vld [vmem:[%s5425_s0 + $0x700] sm:$0xff] }
  0x6d   :  { %2307 = vmatpush1.bf16.msra.mxu1 %v3860_v21  ;;  %2195 = vmatprep.subr.bf16.mxu0 %v3865_v26  ;;  %v275_v21 = vld [vmem:[%s5425_s0 + $0x790] sm:$0xff]  ;;  %v38_v26 = vld [vmem:[%s5425_s0 + $0x28] sm:$0xff] }
  0x6e   :  { %2308 = vmatprep.subr.bf16.mxu1 %v3868_v27  ;;  %v54_v27 = vld [vmem:[%s5425_s0 + $0xa8] sm:$0xff] }
  0x6f   :  { %2026 = vmatmul.mubr.bf16.gmra.mxu0 %v353_v32  ;;  %v3907_v32 = vld [vmem:[#allocation2 + $0x284] ss:$8 sps:$4 sm:$0xff]   ;;  %v294_v35 = vpack.c.bf16 %v54_v27, %v38_v26  ;;  %v136_v26 = vld [vmem:[%s5425_s0 + $0x338] sm:$0xff] }
  0x70   :  { %2139 = vmatmul.mubr.bf16.gmra.mxu1 %v355_v33  ;;  %2196 = vmatpush2.bf16.msra.mxu0 %v3863_v28  ;;  %v401_v28 = vpack.c.bf16 %v273_v19, %v257_v18  ;;  %v3910_v33 = vld [vmem:[#allocation2 + $0x384] ss:$8 sps:$4 sm:$0xff]   ;;  %v3937_v18 = vld [vmem:[#allocation2 + $0x434] ss:$8 sps:$4 sm:$0xff]  }
  0x71   :  { %2309 = vmatpush2.bf16.msra.mxu1 %v3866_v29  ;;  %2197 = vmatprep.subr.bf16.mxu0 %v3871_v36  ;;  %v403_v29 = vpack.c.bf16 %v275_v21, %v259_v20  ;;  %v296_v36 = vpack.c.bf16 %v56_v31, %v40_v30  ;;  %v3940_v19 = vld [vmem:[#allocation2 + $0x534] ss:$8 sps:$4 sm:$0xff]   ;;  %v3935_v20 = vld [vmem:[#allocation2 + $0x430] ss:$8 sps:$4 sm:$0xff]   ;;  %v3941_v30 = vld [vmem:[#allocation2 + $0x420] ss:$8 sps:$4 sm:$0xff]  }
  0x72   :  { %2310 = vmatprep.subr.bf16.mxu1 %v3874_v37  ;;  %2035 = vmatprep.mubr.bf16.mxu0 %v370_v39  ;;  %v3908_v37 = vld [vmem:[#allocation2 + $0x380] ss:$8 sps:$4 sm:$0xff]   ;;  %v3938_v21 = vld [vmem:[#allocation2 + $0x530] ss:$8 sps:$4 sm:$0xff]  }
  0x73   :  { %2148 = vmatprep.mubr.bf16.mxu1 %v372_v40  ;;  %v53_v39 = vld [vmem:[%s5425_s0 + $0xa0] sm:$0xff]  ;;  %v39_v40 = vld [vmem:[%s5425_s0 + $0x30] sm:$0xff]  ;;  %v152_v27 = vld [vmem:[%s5425_s0 + $0x3b8] sm:$0xff] }
  0x74   :  { %2198 = vmatpush2.bf16.msra.mxu0 %v3869_v38  ;;  %v37_v38 = vld [vmem:[%s5425_s0 + $0x20] sm:$0xff] }
  0x75   :  { %2311 = vmatpush2.bf16.msra.mxu1 %v3872_v41  ;;  %2199 = vmatprep.subr.bf16.mxu0 %v3877_v46  ;;  %v55_v41 = vld [vmem:[%s5425_s0 + $0xb0] sm:$0xff]  ;;  %v70_v46 = vld [vmem:[%s5425_s0 + $0x128] sm:$0xff] }
  0x76   :  { %2312 = vmatprep.subr.bf16.mxu1 %v3880_v47  ;;  %v86_v47 = vld [vmem:[%s5425_s0 + $0x1a8] sm:$0xff] }
  0x77   :  { %2036 = vmatmul.mubr.bf16.gmra.mxu0 %v369_v52  ;;  %v3919_v52 = vld [vmem:[#allocation2 + $0x464] ss:$8 sps:$4 sm:$0xff]   ;;  %v310_v55 = vpack.c.bf16 %v86_v47, %v70_v46  ;;  %v168_v46 = vld [vmem:[%s5425_s0 + $0x438] sm:$0xff] }
  0x78   :  { %2149 = vmatmul.mubr.bf16.gmra.mxu1 %v371_v53  ;;  %2200 = vmatpush2.bf16.msra.mxu0 %v3875_v48  ;;  %v293_v48 = vpack.c.bf16 %v53_v39, %v37_v38  ;;  %v3922_v53 = vld [vmem:[#allocation2 + $0x564] ss:$8 sps:$4 sm:$0xff]   ;;  %v3949_v38 = vld [vmem:[#allocation2 + $0x414] ss:$8 sps:$4 sm:$0xff]  }
  0x79   :  { %2313 = vmatpush2.bf16.msra.mxu1 %v3878_v49  ;;  %2201 = vmatprep.subr.bf16.mxu0 %v3883_v56  ;;  %v295_v49 = vpack.c.bf16 %v55_v41, %v39_v40  ;;  %v312_v56 = vpack.c.bf16 %v88_v51, %v72_v50  ;;  %v3952_v39 = vld [vmem:[#allocation2 + $0x514] ss:$8 sps:$4 sm:$0xff]   ;;  %v3947_v40 = vld [vmem:[#allocation2 + $0x410] ss:$8 sps:$4 sm:$0xff]   ;;  %v3953_v50 = vld [vmem:[#allocation2 + $0x400] ss:$8 sps:$4 sm:$0xff]  }
  0x7a   :  { %2314 = vmatprep.subr.bf16.mxu1 %v3886_v57  ;;  %2045 = vmatprep.mubr.bf16.mxu0 %v386_v59  ;;  %v3920_v57 = vld [vmem:[#allocation2 + $0x560] ss:$8 sps:$4 sm:$0xff]   ;;  %v3950_v41 = vld [vmem:[#allocation2 + $0x510] ss:$8 sps:$4 sm:$0xff]  }
  0x7b   :  { %2158 = vmatprep.mubr.bf16.mxu1 %v388_v60  ;;  %v85_v59 = vld [vmem:[%s5425_s0 + $0x1a0] sm:$0xff]  ;;  %v71_v60 = vld [vmem:[%s5425_s0 + $0x130] sm:$0xff]  ;;  %v184_v47 = vld [vmem:[%s5425_s0 + $0x4b8] sm:$0xff] }
  0x7c   :  { %2202 = vmatpush2.bf16.msra.mxu0 %v3881_v58  ;;  %v69_v58 = vld [vmem:[%s5425_s0 + $0x120] sm:$0xff] }
  0x7d   :  { %2315 = vmatpush2.bf16.msra.mxu1 %v3884_v61  ;;  %2203 = vmatprep.subr.bf16.mxu0 %v3889_v2  ;;  %v87_v61 = vld [vmem:[%s5425_s0 + $0x1b0] sm:$0xff]  ;;  %v102_v2 = vld [vmem:[%s5425_s0 + $0x228] sm:$0xff] }
  0x7e   :  { %2316 = vmatprep.subr.bf16.mxu1 %v3892_v3  ;;  %v118_v3 = vld [vmem:[%s5425_s0 + $0x2a8] sm:$0xff] }
  0x7f   :  { %2046 = vmatmul.mubr.bf16.gmra.mxu0 %v385_v8  ;;  %v3931_v8 = vld [vmem:[#allocation2 + $0x444] ss:$8 sps:$4 sm:$0xff]   ;;  %v326_v11 = vpack.c.bf16 %v118_v3, %v102_v2  ;;  %v200_v2 = vld [vmem:[%s5425_s0 + $0x538] sm:$0xff] }
  0x80   :  { %2159 = vmatmul.mubr.bf16.gmra.mxu1 %v387_v9  ;;  %2204 = vmatpush2.bf16.msra.mxu0 %v3887_v4  ;;  %v309_v4 = vpack.c.bf16 %v85_v59, %v69_v58  ;;  %v3934_v9 = vld [vmem:[#allocation2 + $0x544] ss:$8 sps:$4 sm:$0xff]   ;;  %v3961_v58 = vld [vmem:[#allocation2 + $0x4f4] ss:$8 sps:$4 sm:$0xff]  }
  0x81   :  { %2317 = vmatpush2.bf16.msra.mxu1 %v3890_v5  ;;  %2205 = vmatprep.subr.bf16.mxu0 %v3895_v12  ;;  %v311_v5 = vpack.c.bf16 %v87_v61, %v71_v60  ;;  %v328_v12 = vpack.c.bf16 %v120_v7, %v104_v6  ;;  %v3964_v59 = vld [vmem:[#allocation2 + $0x5f4] ss:$8 sps:$4 sm:$0xff]   ;;  %v3959_v60 = vld [vmem:[#allocation2 + $0x4f0] ss:$8 sps:$4 sm:$0xff]   ;;  %v3965_v6 = vld [vmem:[#allocation2 + $0x4e0] ss:$8 sps:$4 sm:$0xff]  }
  0x82   :  { %2318 = vmatprep.subr.bf16.mxu1 %v3898_v13  ;;  %2055 = vmatprep.mubr.bf16.mxu0 %v402_v15  ;;  %v3932_v13 = vld [vmem:[#allocation2 + $0x540] ss:$8 sps:$4 sm:$0xff]   ;;  %v3962_v61 = vld [vmem:[#allocation2 + $0x5f0] ss:$8 sps:$4 sm:$0xff]  }
  0x83   :  { %2168 = vmatprep.mubr.bf16.mxu1 %v404_v16  ;;  %v117_v15 = vld [vmem:[%s5425_s0 + $0x2a0] sm:$0xff]  ;;  %v103_v16 = vld [vmem:[%s5425_s0 + $0x230] sm:$0xff]  ;;  %v216_v3 = vld [vmem:[%s5425_s0 + $0x5b8] sm:$0xff] }
  0x84   :  { %2206 = vmatpush2.bf16.msra.mxu0 %v3893_v14  ;;  %v101_v14 = vld [vmem:[%s5425_s0 + $0x220] sm:$0xff] }
  0x85   :  { %2319 = vmatpush2.bf16.msra.mxu1 %v3896_v17  ;;  %2207 = vmatprep.subr.bf16.mxu0 %v3901_v22  ;;  %v119_v17 = vld [vmem:[%s5425_s0 + $0x2b0] sm:$0xff]  ;;  %v134_v22 = vld [vmem:[%s5425_s0 + $0x328] sm:$0xff] }
  0x86   :  { %2320 = vmatprep.subr.bf16.mxu1 %v3904_v23  ;;  %v150_v23 = vld [vmem:[%s5425_s0 + $0x3a8] sm:$0xff] }
  0x87   :  { %2056 = vmatmul.mubr.bf16.gmra.mxu0 %v401_v28  ;;  %v3943_v28 = vld [vmem:[#allocation2 + $0x424] ss:$8 sps:$4 sm:$0xff]   ;;  %v342_v31 = vpack.c.bf16 %v150_v23, %v134_v22  ;;  %v232_v22 = vld [vmem:[%s5425_s0 + $0x638] sm:$0xff] }
  0x88   :  { %2169 = vmatmul.mubr.bf16.gmra.mxu1 %v403_v29  ;;  %2208 = vmatpush2.bf16.msra.mxu0 %v3899_v24  ;;  %v325_v24 = vpack.c.bf16 %v117_v15, %v101_v14  ;;  %v3946_v29 = vld [vmem:[#allocation2 + $0x524] ss:$8 sps:$4 sm:$0xff]   ;;  %v3973_v14 = vld [vmem:[#allocation2 + $0x4d4] ss:$8 sps:$4 sm:$0xff]  }
  0x89   :  { %2321 = vmatpush2.bf16.msra.mxu1 %v3902_v25  ;;  %2209 = vmatprep.subr.bf16.mxu0 %v3907_v32  ;;  %v327_v25 = vpack.c.bf16 %v119_v17, %v103_v16  ;;  %v344_v32 = vpack.c.bf16 %v152_v27, %v136_v26  ;;  %v3976_v15 = vld [vmem:[#allocation2 + $0x5d4] ss:$8 sps:$4 sm:$0xff]   ;;  %v3971_v16 = vld [vmem:[#allocation2 + $0x4d0] ss:$8 sps:$4 sm:$0xff]   ;;  %v3977_v26 = vld [vmem:[#allocation2 + $0x4c0] ss:$8 sps:$4 sm:$0xff]  }
  0x8a   :  { %2322 = vmatprep.subr.bf16.mxu1 %v3910_v33  ;;  %2211 = vmatprep.mubr.bf16.mxu0 %v294_v35  ;;  %v3944_v33 = vld [vmem:[#allocation2 + $0x520] ss:$8 sps:$4 sm:$0xff]   ;;  %v3974_v17 = vld [vmem:[#allocation2 + $0x5d0] ss:$8 sps:$4 sm:$0xff]  }
  0x8b   :  { %2324 = vmatprep.mubr.bf16.mxu1 %v296_v36  ;;  %v149_v35 = vld [vmem:[%s5425_s0 + $0x3a0] sm:$0xff]  ;;  %v135_v36 = vld [vmem:[%s5425_s0 + $0x330] sm:$0xff]  ;;  %v248_v23 = vld [vmem:[%s5425_s0 + $0x6b8] sm:$0xff] }
  0x8c   :  { %2210 = vmatpush2.bf16.msra.mxu0 %v3905_v34  ;;  %v133_v34 = vld [vmem:[%s5425_s0 + $0x320] sm:$0xff] }
  0x8d   :  { %2323 = vmatpush2.bf16.msra.mxu1 %v3908_v37  ;;  %2405 = vmatprep.subr.bf16.mxu0 %v3913_v42  ;;  %v151_v37 = vld [vmem:[%s5425_s0 + $0x3b0] sm:$0xff]  ;;  %v166_v42 = vld [vmem:[%s5425_s0 + $0x428] sm:$0xff] }
  0x8e   :  { %2518 = vmatprep.subr.bf16.mxu1 %v3916_v43  ;;  %v182_v43 = vld [vmem:[%s5425_s0 + $0x4a8] sm:$0xff] }
  0x8f   :  { %2212 = vmatmul.mubr.bf16.vlgmr.msra.gmra.mxu0 %v293_v48  ;;  %v3955_v48 = vld [vmem:[#allocation2 + $0x404] ss:$8 sps:$4 sm:$0xff]   ;;  %v358_v51 = vpack.c.bf16 %v182_v43, %v166_v42  ;;  %v264_v42 = vld [vmem:[%s5425_s0 + $0x738] sm:$0xff] }
  0x90   :  { %2325 = vmatmul.mubr.bf16.vlgmr.msra.gmra.mxu1 %v295_v49  ;;  %2406 = vmatpush1.bf16.msra.mxu0 %v3911_v44  ;;  %v341_v44 = vpack.c.bf16 %v149_v35, %v133_v34  ;;  %v3958_v49 = vld [vmem:[#allocation2 + $0x504] ss:$8 sps:$4 sm:$0xff]   ;;  %v3985_v34 = vld [vmem:[#allocation2 + $0x4b4] ss:$8 sps:$4 sm:$0xff]  }
  0x91   :  { %2519 = vmatpush1.bf16.msra.mxu1 %v3914_v45  ;;  %2407 = vmatprep.subr.bf16.mxu0 %v3919_v52  ;;  %v343_v45 = vpack.c.bf16 %v151_v37, %v135_v36  ;;  %v360_v52 = vpack.c.bf16 %v184_v47, %v168_v46  ;;  %v3988_v35 = vld [vmem:[#allocation2 + $0x5b4] ss:$8 sps:$4 sm:$0xff]   ;;  %v3983_v36 = vld [vmem:[#allocation2 + $0x4b0] ss:$8 sps:$4 sm:$0xff]   ;;  %v3989_v46 = vld [vmem:[#allocation2 + $0x4a0] ss:$8 sps:$4 sm:$0xff]  }
  0x92   :  { %2520 = vmatprep.subr.bf16.mxu1 %v3922_v53  ;;  %2221 = vmatprep.mubr.bf16.mxu0 %v310_v55  ;;  %v3956_v53 = vld [vmem:[#allocation2 + $0x500] ss:$8 sps:$4 sm:$0xff]   ;;  %v3986_v37 = vld [vmem:[#allocation2 + $0x5b0] ss:$8 sps:$4 sm:$0xff]  }
  0x93   :  { %2334 = vmatprep.mubr.bf16.mxu1 %v312_v56  ;;  %v181_v55 = vld [vmem:[%s5425_s0 + $0x4a0] sm:$0xff]  ;;  %v167_v56 = vld [vmem:[%s5425_s0 + $0x430] sm:$0xff]  ;;  %v280_v43 = vld [vmem:[%s5425_s0 + $0x7b8] sm:$0xff] }
  0x94   :  { %2408 = vmatpush1.bf16.msra.mxu0 %v3917_v54  ;;  %v165_v54 = vld [vmem:[%s5425_s0 + $0x420] sm:$0xff] }
  0x95   :  { %2521 = vmatpush1.bf16.msra.mxu1 %v3920_v57  ;;  %2409 = vmatprep.subr.bf16.mxu0 %v3925_v62  ;;  %v183_v57 = vld [vmem:[%s5425_s0 + $0x4b0] sm:$0xff]  ;;  %v198_v62 = vld [vmem:[%s5425_s0 + $0x528] sm:$0xff] }
  0x96   :  { %2522 = vmatprep.subr.bf16.mxu1 %v3928_v63  ;;  %v214_v63 = vld [vmem:[%s5425_s0 + $0x5a8] sm:$0xff] }
  0x97   :  { %2222 = vmatmul.mubr.bf16.gmra.mxu0 %v309_v4  ;;  %v3967_v4 = vld [vmem:[#allocation2 + $0x4e4] ss:$8 sps:$4 sm:$0xff]   ;;  %v374_v7 = vpack.c.bf16 %v214_v63, %v198_v62  ;;  %v44_v62 = vld [vmem:[%s5425_s0 + $0x58] sm:$0xff] }
  0x98   :  { %2335 = vmatmul.mubr.bf16.gmra.mxu1 %v311_v5  ;;  %2410 = vmatpush1.bf16.msra.mxu0 %v3923_v0  ;;  %v357_v0 = vpack.c.bf16 %v181_v55, %v165_v54  ;;  %v3970_v5 = vld [vmem:[#allocation2 + $0x5e4] ss:$8 sps:$4 sm:$0xff]   ;;  %v3997_v54 = vld [vmem:[#allocation2 + $0x494] ss:$8 sps:$4 sm:$0xff]  }
  0x99   :  { %2523 = vmatpush1.bf16.msra.mxu1 %v3926_v1  ;;  %2411 = vmatprep.subr.bf16.mxu0 %v3931_v8  ;;  %v359_v1 = vpack.c.bf16 %v183_v57, %v167_v56  ;;  %v376_v8 = vpack.c.bf16 %v216_v3, %v200_v2  ;;  %v4000_v55 = vld [vmem:[#allocation2 + $0x594] ss:$8 sps:$4 sm:$0xff]   ;;  %v3995_v56 = vld [vmem:[#allocation2 + $0x490] ss:$8 sps:$4 sm:$0xff]   ;;  %v4001_v2 = vld [vmem:[#allocation2 + $0x480] ss:$8 sps:$4 sm:$0xff]  }
  0x9a   :  { %2524 = vmatprep.subr.bf16.mxu1 %v3934_v9  ;;  %2231 = vmatprep.mubr.bf16.mxu0 %v326_v11  ;;  %v3968_v9 = vld [vmem:[#allocation2 + $0x5e0] ss:$8 sps:$4 sm:$0xff]   ;;  %v3998_v57 = vld [vmem:[#allocation2 + $0x590] ss:$8 sps:$4 sm:$0xff]  }
  0x9b   :  { %2344 = vmatprep.mubr.bf16.mxu1 %v328_v12  ;;  %v213_v11 = vld [vmem:[%s5425_s0 + $0x5a0] sm:$0xff]  ;;  %v199_v12 = vld [vmem:[%s5425_s0 + $0x530] sm:$0xff]  ;;  %v60_v63 = vld [vmem:[%s5425_s0 + $0xd8] sm:$0xff] }
  0x9c   :  { %2412 = vmatpush1.bf16.msra.mxu0 %v3929_v10  ;;  %v197_v10 = vld [vmem:[%s5425_s0 + $0x520] sm:$0xff] }
  0x9d   :  { %2525 = vmatpush1.bf16.msra.mxu1 %v3932_v13  ;;  %2413 = vmatprep.subr.bf16.mxu0 %v3937_v18  ;;  %v215_v13 = vld [vmem:[%s5425_s0 + $0x5b0] sm:$0xff]  ;;  %v230_v18 = vld [vmem:[%s5425_s0 + $0x628] sm:$0xff] }
  0x9e   :  { %2526 = vmatprep.subr.bf16.mxu1 %v3940_v19  ;;  %v246_v19 = vld [vmem:[%s5425_s0 + $0x6a8] sm:$0xff] }
  0x9f   :  { %2232 = vmatmul.mubr.bf16.gmra.mxu0 %v325_v24  ;;  %v3979_v24 = vld [vmem:[#allocation2 + $0x4c4] ss:$8 sps:$4 sm:$0xff]   ;;  %v390_v27 = vpack.c.bf16 %v246_v19, %v230_v18  ;;  %v76_v18 = vld [vmem:[%s5425_s0 + $0x158] sm:$0xff] }
  0xa0   :  { %2345 = vmatmul.mubr.bf16.gmra.mxu1 %v327_v25  ;;  %2414 = vmatpush1.bf16.msra.mxu0 %v3935_v20  ;;  %v373_v20 = vpack.c.bf16 %v213_v11, %v197_v10  ;;  %v3982_v25 = vld [vmem:[#allocation2 + $0x5c4] ss:$8 sps:$4 sm:$0xff]   ;;  %v4009_v10 = vld [vmem:[#allocation2 + $0x674] ss:$8 sps:$4 sm:$0xff]  }
  0xa1   :  { %2527 = vmatpush1.bf16.msra.mxu1 %v3938_v21  ;;  %2415 = vmatprep.subr.bf16.mxu0 %v3943_v28  ;;  %v375_v21 = vpack.c.bf16 %v215_v13, %v199_v12  ;;  %v392_v28 = vpack.c.bf16 %v248_v23, %v232_v22  ;;  %v4012_v11 = vld [vmem:[#allocation2 + $0x774] ss:$8 sps:$4 sm:$0xff]   ;;  %v4007_v12 = vld [vmem:[#allocation2 + $0x670] ss:$8 sps:$4 sm:$0xff]   ;;  %v4013_v22 = vld [vmem:[#allocation2 + $0x660] ss:$8 sps:$4 sm:$0xff]  }
  0xa2   :  { %2528 = vmatprep.subr.bf16.mxu1 %v3946_v29  ;;  %2241 = vmatprep.mubr.bf16.mxu0 %v342_v31  ;;  %v3980_v29 = vld [vmem:[#allocation2 + $0x5c0] ss:$8 sps:$4 sm:$0xff]   ;;  %v4010_v13 = vld [vmem:[#allocation2 + $0x770] ss:$8 sps:$4 sm:$0xff]  }
  0xa3   :  { %2354 = vmatprep.mubr.bf16.mxu1 %v344_v32  ;;  %v245_v31 = vld [vmem:[%s5425_s0 + $0x6a0] sm:$0xff]  ;;  %v231_v32 = vld [vmem:[%s5425_s0 + $0x630] sm:$0xff]  ;;  %v92_v19 = vld [vmem:[%s5425_s0 + $0x1d8] sm:$0xff] }
  0xa4   :  { %2416 = vmatpush1.bf16.msra.mxu0 %v3941_v30  ;;  %v229_v30 = vld [vmem:[%s5425_s0 + $0x620] sm:$0xff] }
  0xa5   :  { %2529 = vmatpush1.bf16.msra.mxu1 %v3944_v33  ;;  %2417 = vmatprep.subr.bf16.mxu0 %v3949_v38  ;;  %v247_v33 = vld [vmem:[%s5425_s0 + $0x6b0] sm:$0xff]  ;;  %v262_v38 = vld [vmem:[%s5425_s0 + $0x728] sm:$0xff] }
  0xa6   :  { %2530 = vmatprep.subr.bf16.mxu1 %v3952_v39  ;;  %v278_v39 = vld [vmem:[%s5425_s0 + $0x7a8] sm:$0xff] }
  0xa7   :  { %2242 = vmatmul.mubr.bf16.gmra.mxu0 %v341_v44  ;;  %v3991_v44 = vld [vmem:[#allocation2 + $0x4a4] ss:$8 sps:$4 sm:$0xff]   ;;  %v406_v47 = vpack.c.bf16 %v278_v39, %v262_v38  ;;  %v108_v38 = vld [vmem:[%s5425_s0 + $0x258] sm:$0xff] }
  0xa8   :  { %2355 = vmatmul.mubr.bf16.gmra.mxu1 %v343_v45  ;;  %2418 = vmatpush1.bf16.msra.mxu0 %v3947_v40  ;;  %v389_v40 = vpack.c.bf16 %v245_v31, %v229_v30  ;;  %v3994_v45 = vld [vmem:[#allocation2 + $0x5a4] ss:$8 sps:$4 sm:$0xff]   ;;  %v4021_v30 = vld [vmem:[#allocation2 + $0x654] ss:$8 sps:$4 sm:$0xff]  }
  0xa9   :  { %2531 = vmatpush1.bf16.msra.mxu1 %v3950_v41  ;;  %2419 = vmatprep.subr.bf16.mxu0 %v3955_v48  ;;  %v391_v41 = vpack.c.bf16 %v247_v33, %v231_v32  ;;  %v408_v48 = vpack.c.bf16 %v280_v43, %v264_v42  ;;  %v4024_v31 = vld [vmem:[#allocation2 + $0x754] ss:$8 sps:$4 sm:$0xff]   ;;  %v4019_v32 = vld [vmem:[#allocation2 + $0x650] ss:$8 sps:$4 sm:$0xff]   ;;  %v4025_v42 = vld [vmem:[#allocation2 + $0x640] ss:$8 sps:$4 sm:$0xff]  }
  0xaa   :  { %2532 = vmatprep.subr.bf16.mxu1 %v3958_v49  ;;  %2251 = vmatprep.mubr.bf16.mxu0 %v358_v51  ;;  %v3992_v49 = vld [vmem:[#allocation2 + $0x5a0] ss:$8 sps:$4 sm:$0xff]   ;;  %v4022_v33 = vld [vmem:[#allocation2 + $0x750] ss:$8 sps:$4 sm:$0xff]  }
  0xab   :  { %2364 = vmatprep.mubr.bf16.mxu1 %v360_v52  ;;  %v277_v51 = vld [vmem:[%s5425_s0 + $0x7a0] sm:$0xff]  ;;  %v263_v52 = vld [vmem:[%s5425_s0 + $0x730] sm:$0xff]  ;;  %v124_v39 = vld [vmem:[%s5425_s0 + $0x2d8] sm:$0xff] }
  0xac   :  { %2420 = vmatpush1.bf16.msra.mxu0 %v3953_v50  ;;  %v261_v50 = vld [vmem:[%s5425_s0 + $0x720] sm:$0xff] }
  0xad   :  { %2533 = vmatpush1.bf16.msra.mxu1 %v3956_v53  ;;  %2421 = vmatprep.subr.bf16.mxu0 %v3961_v58  ;;  %v279_v53 = vld [vmem:[%s5425_s0 + $0x7b0] sm:$0xff]  ;;  %v42_v58 = vld [vmem:[%s5425_s0 + $0x48] sm:$0xff] }
  0xae   :  { %2534 = vmatprep.subr.bf16.mxu1 %v3964_v59  ;;  %v58_v59 = vld [vmem:[%s5425_s0 + $0xc8] sm:$0xff] }
  0xaf   :  { %2252 = vmatmul.mubr.bf16.gmra.mxu0 %v357_v0  ;;  %v4003_v0 = vld [vmem:[#allocation2 + $0x484] ss:$8 sps:$4 sm:$0xff]   ;;  %v298_v3 = vpack.c.bf16 %v58_v59, %v42_v58  ;;  %v140_v58 = vld [vmem:[%s5425_s0 + $0x358] sm:$0xff] }
  0xb0   :  { %2365 = vmatmul.mubr.bf16.gmra.mxu1 %v359_v1  ;;  %2422 = vmatpush2.bf16.msra.mxu0 %v3959_v60  ;;  %v405_v60 = vpack.c.bf16 %v277_v51, %v261_v50  ;;  %v4006_v1 = vld [vmem:[#allocation2 + $0x584] ss:$8 sps:$4 sm:$0xff]   ;;  %v4033_v50 = vld [vmem:[#allocation2 + $0x634] ss:$8 sps:$4 sm:$0xff]  }
  0xb1   :  { %2535 = vmatpush2.bf16.msra.mxu1 %v3962_v61  ;;  %2423 = vmatprep.subr.bf16.mxu0 %v3967_v4  ;;  %v407_v61 = vpack.c.bf16 %v279_v53, %v263_v52  ;;  %v300_v4 = vpack.c.bf16 %v60_v63, %v44_v62  ;;  %v4036_v51 = vld [vmem:[#allocation2 + $0x734] ss:$8 sps:$4 sm:$0xff]   ;;  %v4031_v52 = vld [vmem:[#allocation2 + $0x630] ss:$8 sps:$4 sm:$0xff]   ;;  %v4037_v62 = vld [vmem:[#allocation2 + $0x620] ss:$8 sps:$4 sm:$0xff]  }
  0xb2   :  { %2536 = vmatprep.subr.bf16.mxu1 %v3970_v5  ;;  %2261 = vmatprep.mubr.bf16.mxu0 %v374_v7  ;;  %v4004_v5 = vld [vmem:[#allocation2 + $0x580] ss:$8 sps:$4 sm:$0xff]   ;;  %v4034_v53 = vld [vmem:[#allocation2 + $0x730] ss:$8 sps:$4 sm:$0xff]  }
  0xb3   :  { %2374 = vmatprep.mubr.bf16.mxu1 %v376_v8  ;;  %v57_v7 = vld [vmem:[%s5425_s0 + $0xc0] sm:$0xff]  ;;  %v43_v8 = vld [vmem:[%s5425_s0 + $0x50] sm:$0xff]  ;;  %v156_v59 = vld [vmem:[%s5425_s0 + $0x3d8] sm:$0xff] }
  0xb4   :  { %2424 = vmatpush2.bf16.msra.mxu0 %v3965_v6  ;;  %v41_v6 = vld [vmem:[%s5425_s0 + $0x40] sm:$0xff] }
  0xb5   :  { %2537 = vmatpush2.bf16.msra.mxu1 %v3968_v9  ;;  %2425 = vmatprep.subr.bf16.mxu0 %v3973_v14  ;;  %v59_v9 = vld [vmem:[%s5425_s0 + $0xd0] sm:$0xff]  ;;  %v74_v14 = vld [vmem:[%s5425_s0 + $0x148] sm:$0xff] }
  0xb6   :  { %2538 = vmatprep.subr.bf16.mxu1 %v3976_v15  ;;  %v90_v15 = vld [vmem:[%s5425_s0 + $0x1c8] sm:$0xff] }
  0xb7   :  { %2262 = vmatmul.mubr.bf16.gmra.mxu0 %v373_v20  ;;  %v4015_v20 = vld [vmem:[#allocation2 + $0x664] ss:$8 sps:$4 sm:$0xff]   ;;  %v314_v23 = vpack.c.bf16 %v90_v15, %v74_v14  ;;  %v172_v14 = vld [vmem:[%s5425_s0 + $0x458] sm:$0xff] }
  0xb8   :  { %2375 = vmatmul.mubr.bf16.gmra.mxu1 %v375_v21  ;;  %2426 = vmatpush2.bf16.msra.mxu0 %v3971_v16  ;;  %v297_v16 = vpack.c.bf16 %v57_v7, %v41_v6  ;;  %v4018_v21 = vld [vmem:[#allocation2 + $0x764] ss:$8 sps:$4 sm:$0xff]   ;;  %v4045_v6 = vld [vmem:[#allocation2 + $0x614] ss:$8 sps:$4 sm:$0xff]  }
  0xb9   :  { %2539 = vmatpush2.bf16.msra.mxu1 %v3974_v17  ;;  %2427 = vmatprep.subr.bf16.mxu0 %v3979_v24  ;;  %v299_v17 = vpack.c.bf16 %v59_v9, %v43_v8  ;;  %v316_v24 = vpack.c.bf16 %v92_v19, %v76_v18  ;;  %v4048_v7 = vld [vmem:[#allocation2 + $0x714] ss:$8 sps:$4 sm:$0xff]   ;;  %v4043_v8 = vld [vmem:[#allocation2 + $0x610] ss:$8 sps:$4 sm:$0xff]   ;;  %v4049_v18 = vld [vmem:[#allocation2 + $0x600] ss:$8 sps:$4 sm:$0xff]  }
  0xba   :  { %2540 = vmatprep.subr.bf16.mxu1 %v3982_v25  ;;  %2271 = vmatprep.mubr.bf16.mxu0 %v390_v27  ;;  %v4016_v25 = vld [vmem:[#allocation2 + $0x760] ss:$8 sps:$4 sm:$0xff]   ;;  %v4046_v9 = vld [vmem:[#allocation2 + $0x710] ss:$8 sps:$4 sm:$0xff]  }
  0xbb   :  { %2384 = vmatprep.mubr.bf16.mxu1 %v392_v28  ;;  %v89_v27 = vld [vmem:[%s5425_s0 + $0x1c0] sm:$0xff]  ;;  %v75_v28 = vld [vmem:[%s5425_s0 + $0x150] sm:$0xff]  ;;  %v188_v15 = vld [vmem:[%s5425_s0 + $0x4d8] sm:$0xff] }
  0xbc   :  { %2428 = vmatpush2.bf16.msra.mxu0 %v3977_v26  ;;  %v73_v26 = vld [vmem:[%s5425_s0 + $0x140] sm:$0xff] }
  0xbd   :  { %2541 = vmatpush2.bf16.msra.mxu1 %v3980_v29  ;;  %2429 = vmatprep.subr.bf16.mxu0 %v3985_v34  ;;  %v91_v29 = vld [vmem:[%s5425_s0 + $0x1d0] sm:$0xff]  ;;  %v106_v34 = vld [vmem:[%s5425_s0 + $0x248] sm:$0xff] }
  0xbe   :  { %2542 = vmatprep.subr.bf16.mxu1 %v3988_v35  ;;  %v122_v35 = vld [vmem:[%s5425_s0 + $0x2c8] sm:$0xff] }
  0xbf   :  { %2272 = vmatmul.mubr.bf16.gmra.mxu0 %v389_v40  ;;  %v4027_v40 = vld [vmem:[#allocation2 + $0x644] ss:$8 sps:$4 sm:$0xff]   ;;  %v330_v43 = vpack.c.bf16 %v122_v35, %v106_v34  ;;  %v204_v34 = vld [vmem:[%s5425_s0 + $0x558] sm:$0xff] }
  0xc0   :  { %2385 = vmatmul.mubr.bf16.gmra.mxu1 %v391_v41  ;;  %2430 = vmatpush2.bf16.msra.mxu0 %v3983_v36  ;;  %v313_v36 = vpack.c.bf16 %v89_v27, %v73_v26  ;;  %v4030_v41 = vld [vmem:[#allocation2 + $0x744] ss:$8 sps:$4 sm:$0xff]   ;;  %v4057_v26 = vld [vmem:[#allocation2 + $0x6f4] ss:$8 sps:$4 sm:$0xff]  }
  0xc1   :  { %2543 = vmatpush2.bf16.msra.mxu1 %v3986_v37  ;;  %2431 = vmatprep.subr.bf16.mxu0 %v3991_v44  ;;  %v315_v37 = vpack.c.bf16 %v91_v29, %v75_v28  ;;  %v332_v44 = vpack.c.bf16 %v124_v39, %v108_v38  ;;  %v4060_v27 = vld [vmem:[#allocation2 + $0x7f4] ss:$8 sps:$4 sm:$0xff]   ;;  %v4055_v28 = vld [vmem:[#allocation2 + $0x6f0] ss:$8 sps:$4 sm:$0xff]   ;;  %v4061_v38 = vld [vmem:[#allocation2 + $0x6e0] ss:$8 sps:$4 sm:$0xff]  }
  0xc2   :  { %2544 = vmatprep.subr.bf16.mxu1 %v3994_v45  ;;  %2281 = vmatprep.mubr.bf16.mxu0 %v406_v47  ;;  %v4028_v45 = vld [vmem:[#allocation2 + $0x740] ss:$8 sps:$4 sm:$0xff]   ;;  %v4058_v29 = vld [vmem:[#allocation2 + $0x7f0] ss:$8 sps:$4 sm:$0xff]  }
  0xc3   :  { %2394 = vmatprep.mubr.bf16.mxu1 %v408_v48  ;;  %v121_v47 = vld [vmem:[%s5425_s0 + $0x2c0] sm:$0xff]  ;;  %v107_v48 = vld [vmem:[%s5425_s0 + $0x250] sm:$0xff]  ;;  %v220_v35 = vld [vmem:[%s5425_s0 + $0x5d8] sm:$0xff] }
  0xc4   :  { %2432 = vmatpush2.bf16.msra.mxu0 %v3989_v46  ;;  %v105_v46 = vld [vmem:[%s5425_s0 + $0x240] sm:$0xff] }
  0xc5   :  { %2545 = vmatpush2.bf16.msra.mxu1 %v3992_v49  ;;  %2433 = vmatprep.subr.bf16.mxu0 %v3997_v54  ;;  %v123_v49 = vld [vmem:[%s5425_s0 + $0x2d0] sm:$0xff]  ;;  %v138_v54 = vld [vmem:[%s5425_s0 + $0x348] sm:$0xff] }
  0xc6   :  { %2546 = vmatprep.subr.bf16.mxu1 %v4000_v55  ;;  %v154_v55 = vld [vmem:[%s5425_s0 + $0x3c8] sm:$0xff] }
  0xc7   :  { %2282 = vmatmul.mubr.bf16.gmra.mxu0 %v405_v60  ;;  %v4039_v60 = vld [vmem:[#allocation2 + $0x624] ss:$8 sps:$4 sm:$0xff]   ;;  %v346_v63 = vpack.c.bf16 %v154_v55, %v138_v54  ;;  %v236_v54 = vld [vmem:[%s5425_s0 + $0x658] sm:$0xff] }
  0xc8   :  { %2395 = vmatmul.mubr.bf16.gmra.mxu1 %v407_v61  ;;  %2434 = vmatpush2.bf16.msra.mxu0 %v3995_v56  ;;  %v329_v56 = vpack.c.bf16 %v121_v47, %v105_v46  ;;  %v4042_v61 = vld [vmem:[#allocation2 + $0x724] ss:$8 sps:$4 sm:$0xff]   ;;  %v4069_v46 = vld [vmem:[#allocation2 + $0x6d4] ss:$8 sps:$4 sm:$0xff]  }
  0xc9   :  { %2547 = vmatpush2.bf16.msra.mxu1 %v3998_v57  ;;  %2435 = vmatprep.subr.bf16.mxu0 %v4003_v0  ;;  %v331_v57 = vpack.c.bf16 %v123_v49, %v107_v48  ;;  %v348_v0 = vpack.c.bf16 %v156_v59, %v140_v58  ;;  %v4072_v47 = vld [vmem:[#allocation2 + $0x7d4] ss:$8 sps:$4 sm:$0xff]   ;;  %v4067_v48 = vld [vmem:[#allocation2 + $0x6d0] ss:$8 sps:$4 sm:$0xff]  }
  0xca   :  { %2548 = vmatprep.subr.bf16.mxu1 %v4006_v1  ;;  %2437 = vmatprep.mubr.bf16.mxu0 %v298_v3  ;;  %v4040_v1 = vld [vmem:[#allocation2 + $0x720] ss:$8 sps:$4 sm:$0xff]   ;;  %v4070_v49 = vld [vmem:[#allocation2 + $0x7d0] ss:$8 sps:$4 sm:$0xff]  }
  0xcb   :  { %2550 = vmatprep.mubr.bf16.mxu1 %v300_v4  ;;  %v153_v3 = vld [vmem:[%s5425_s0 + $0x3c0] sm:$0xff]  ;;  %v139_v4 = vld [vmem:[%s5425_s0 + $0x350] sm:$0xff]  ;;  %v252_v55 = vld [vmem:[%s5425_s0 + $0x6d8] sm:$0xff] }
  0xcc   :  { %2436 = vmatpush2.bf16.msra.mxu0 %v4001_v2  ;;  %v137_v2 = vld [vmem:[%s5425_s0 + $0x340] sm:$0xff]  ;;  %v396_v59 = vpack.c.bf16 %v252_v55, %v236_v54 }
  0xcd   :  { %2549 = vmatpush2.bf16.msra.mxu1 %v4004_v5  ;;  %2631 = vmatprep.subr.bf16.mxu0 %v4009_v10  ;;  %v155_v5 = vld [vmem:[%s5425_s0 + $0x3d0] sm:$0xff]  ;;  %v170_v10 = vld [vmem:[%s5425_s0 + $0x448] sm:$0xff] }
  0xce   :  { %2744 = vmatprep.subr.bf16.mxu1 %v4012_v11  ;;  %v186_v11 = vld [vmem:[%s5425_s0 + $0x4c8] sm:$0xff] }
  0xcf   :  { %2438 = vmatmul.mubr.bf16.vlgmr.msra.gmra.mxu0 %v297_v16  ;;  %v4051_v16 = vld [vmem:[#allocation2 + $0x604] ss:$8 sps:$4 sm:$0xff]   ;;  %v362_v19 = vpack.c.bf16 %v186_v11, %v170_v10  ;;  %v4079_v10 = vld [vmem:[#allocation2 + $0x6b0] ss:$8 sps:$4 sm:$0xff]  }
  0xd0   :  { %2551 = vmatmul.mubr.bf16.vlgmr.msra.gmra.mxu1 %v299_v17  ;;  %2632 = vmatpush1.bf16.msra.mxu0 %v4007_v12  ;;  %v345_v12 = vpack.c.bf16 %v153_v3, %v137_v2  ;;  %v4054_v17 = vld [vmem:[#allocation2 + $0x704] ss:$8 sps:$4 sm:$0xff]   ;;  %v4081_v2 = vld [vmem:[#allocation2 + $0x6b4] ss:$8 sps:$4 sm:$0xff]   ;;  %v4082_v11 = vld [vmem:[#allocation2 + $0x7b0] ss:$8 sps:$4 sm:$0xff]  }
  0xd1   :  { %2745 = vmatpush1.bf16.msra.mxu1 %v4010_v13  ;;  %2633 = vmatprep.subr.bf16.mxu0 %v4015_v20  ;;  %v347_v13 = vpack.c.bf16 %v155_v5, %v139_v4  ;;  %v364_v20 = vpack.c.bf16 %v188_v15, %v172_v14  ;;  %v4084_v3 = vld [vmem:[#allocation2 + $0x7b4] ss:$8 sps:$4 sm:$0xff]   ;;  %v266_v4 = vld [vmem:[%s5425_s0 + $0x748] sm:$0xff] }
  0xd2   :  { %2746 = vmatprep.subr.bf16.mxu1 %v4018_v21  ;;  %2447 = vmatprep.mubr.bf16.mxu0 %v314_v23  ;;  %v4052_v21 = vld [vmem:[#allocation2 + $0x700] ss:$8 sps:$4 sm:$0xff]  }
  0xd3   :  { %2560 = vmatprep.mubr.bf16.mxu1 %v316_v24  ;;  %v185_v23 = vld [vmem:[%s5425_s0 + $0x4c0] sm:$0xff]  ;;  %v171_v24 = vld [vmem:[%s5425_s0 + $0x450] sm:$0xff] }
  0xd4   :  { %2634 = vmatpush1.bf16.msra.mxu0 %v4013_v22  ;;  %v169_v22 = vld [vmem:[%s5425_s0 + $0x440] sm:$0xff] }
  0xd5   :  { %2747 = vmatpush1.bf16.msra.mxu1 %v4016_v25  ;;  %2635 = vmatprep.subr.bf16.mxu0 %v4021_v30  ;;  %v187_v25 = vld [vmem:[%s5425_s0 + $0x4d0] sm:$0xff]  ;;  %v202_v30 = vld [vmem:[%s5425_s0 + $0x548] sm:$0xff] }
  0xd6   :  { %2748 = vmatprep.subr.bf16.mxu1 %v4024_v31  ;;  %v218_v31 = vld [vmem:[%s5425_s0 + $0x5c8] sm:$0xff] }
  0xd7   :  { %2448 = vmatmul.mubr.bf16.gmra.mxu0 %v313_v36  ;;  %v4063_v36 = vld [vmem:[#allocation2 + $0x6e4] ss:$8 sps:$4 sm:$0xff]   ;;  %v378_v39 = vpack.c.bf16 %v218_v31, %v202_v30  ;;  %v4091_v30 = vld [vmem:[#allocation2 + $0x690] ss:$8 sps:$4 sm:$0xff]  }
  0xd8   :  { %2561 = vmatmul.mubr.bf16.gmra.mxu1 %v315_v37  ;;  %2636 = vmatpush1.bf16.msra.mxu0 %v4019_v32  ;;  %v361_v32 = vpack.c.bf16 %v185_v23, %v169_v22  ;;  %v4066_v37 = vld [vmem:[#allocation2 + $0x7e4] ss:$8 sps:$4 sm:$0xff]   ;;  %v4093_v22 = vld [vmem:[#allocation2 + $0x694] ss:$8 sps:$4 sm:$0xff]   ;;  %v4094_v31 = vld [vmem:[#allocation2 + $0x790] ss:$8 sps:$4 sm:$0xff]  }
  0xd9   :  { %2749 = vmatpush1.bf16.msra.mxu1 %v4022_v33  ;;  %2637 = vmatprep.subr.bf16.mxu0 %v4027_v40  ;;  %v363_v33 = vpack.c.bf16 %v187_v25, %v171_v24  ;;  %v380_v40 = vpack.c.bf16 %v220_v35, %v204_v34  ;;  %v4096_v23 = vld [vmem:[#allocation2 + $0x794] ss:$8 sps:$4 sm:$0xff]   ;;  %v46_v24 = vld [vmem:[%s5425_s0 + $0x68] sm:$0xff] }
  0xda   :  { %2750 = vmatprep.subr.bf16.mxu1 %v4030_v41  ;;  %2457 = vmatprep.mubr.bf16.mxu0 %v330_v43  ;;  %v4064_v41 = vld [vmem:[#allocation2 + $0x7e0] ss:$8 sps:$4 sm:$0xff]  }
  0xdb   :  { %2570 = vmatprep.mubr.bf16.mxu1 %v332_v44  ;;  %v217_v43 = vld [vmem:[%s5425_s0 + $0x5c0] sm:$0xff]  ;;  %v203_v44 = vld [vmem:[%s5425_s0 + $0x550] sm:$0xff] }
  0xdc   :  { %2638 = vmatpush1.bf16.msra.mxu0 %v4025_v42  ;;  %v201_v42 = vld [vmem:[%s5425_s0 + $0x540] sm:$0xff] }
  0xdd   :  { %2751 = vmatpush1.bf16.msra.mxu1 %v4028_v45  ;;  %2639 = vmatprep.subr.bf16.mxu0 %v4033_v50  ;;  %v219_v45 = vld [vmem:[%s5425_s0 + $0x5d0] sm:$0xff]  ;;  %v234_v50 = vld [vmem:[%s5425_s0 + $0x648] sm:$0xff] }
  0xde   :  { %2752 = vmatprep.subr.bf16.mxu1 %v4036_v51  ;;  %v250_v51 = vld [vmem:[%s5425_s0 + $0x6c8] sm:$0xff] }
  0xdf   :  { %2458 = vmatmul.mubr.bf16.gmra.mxu0 %v329_v56  ;;  %v4075_v56 = vld [vmem:[#allocation2 + $0x6c4] ss:$8 sps:$4 sm:$0xff]   ;;  %v394_v58 = vpack.c.bf16 %v250_v51, %v234_v50  ;;  %v4097_v34 = vld [vmem:[#allocation2 + $0x680] ss:$8 sps:$4 sm:$0xff]  }
  0xe0   :  { %2571 = vmatmul.mubr.bf16.gmra.mxu1 %v331_v57  ;;  %2640 = vmatpush1.bf16.msra.mxu0 %v4031_v52  ;;  %v377_v52 = vpack.c.bf16 %v217_v43, %v201_v42  ;;  %v4078_v57 = vld [vmem:[#allocation2 + $0x7c4] ss:$8 sps:$4 sm:$0xff]  }
  0xe1   :  { %2753 = vmatpush1.bf16.msra.mxu1 %v4034_v53  ;;  %2641 = vmatprep.subr.bf16.mxu0 %v4039_v60  ;;  %v379_v53 = vpack.c.bf16 %v219_v45, %v203_v44  ;;  %v4073_v60 = vld [vmem:[#allocation2 + $0x6c0] ss:$8 sps:$4 sm:$0xff]   ;;  %v80_v44 = vld [vmem:[%s5425_s0 + $0x178] sm:$0xff] }
  0xe2   :  { %2754 = vmatprep.subr.bf16.mxu1 %v4042_v61  ;;  %2467 = vmatprep.mubr.bf16.mxu0 %v346_v63  ;;  %v4076_v61 = vld [vmem:[#allocation2 + $0x7c0] ss:$8 sps:$4 sm:$0xff]   ;;  %v96_v45 = vld [vmem:[%s5425_s0 + $0x1f8] sm:$0xff] }
  0xe3   :  { %2580 = vmatprep.mubr.bf16.mxu1 %v348_v0  ;;  %v249_v63 = vld [vmem:[%s5425_s0 + $0x6c0] sm:$0xff]  ;;  %v235_v0 = vld [vmem:[%s5425_s0 + $0x650] sm:$0xff]  ;;  %v78_v42 = vld [vmem:[%s5425_s0 + $0x168] sm:$0xff] }
  0xe4   :  { %2642 = vmatpush1.bf16.msra.mxu0 %v4037_v62  ;;  %v233_v62 = vld [vmem:[%s5425_s0 + $0x640] sm:$0xff]  ;;  %v94_v43 = vld [vmem:[%s5425_s0 + $0x1e8] sm:$0xff] }
  0xe5   :  { %2755 = vmatpush1.bf16.msra.mxu1 %v4040_v1  ;;  %2643 = vmatprep.subr.bf16.mxu0 %v4045_v6  ;;  %v251_v1 = vld [vmem:[%s5425_s0 + $0x6d0] sm:$0xff]  ;;  %v393_v5 = vpack.c.bf16 %v249_v63, %v233_v62  ;;  %v77_v50 = vld [vmem:[%s5425_s0 + $0x160] sm:$0xff] }
  0xe6   :  { %2756 = vmatprep.subr.bf16.mxu1 %v4048_v7  ;;  %v395_v6 = vpack.c.bf16 %v251_v1, %v235_v0  ;;  %v282_v7 = vld [vmem:[%s5425_s0 + $0x7c8] sm:$0xff]  ;;  %v93_v51 = vld [vmem:[%s5425_s0 + $0x1e0] sm:$0xff] }
  0xe7   :  { %2468 = vmatmul.mubr.bf16.gmra.mxu0 %v345_v12  ;;  %v4087_v12 = vld [vmem:[#allocation2 + $0x6a4] ss:$8 sps:$4 sm:$0xff]   ;;  %v410_v14 = vpack.c.bf16 %v282_v7, %v266_v4 }
  0xe8   :  { %2581 = vmatmul.mubr.bf16.gmra.mxu1 %v347_v13  ;;  %2644 = vmatpush1.bf16.msra.mxu0 %v4043_v8  ;;  %v268_v8 = vld [vmem:[%s5425_s0 + $0x758] sm:$0xff]  ;;  %v4090_v13 = vld [vmem:[#allocation2 + $0x7a4] ss:$8 sps:$4 sm:$0xff]  }
  0xe9   :  { %2757 = vmatpush1.bf16.msra.mxu1 %v4046_v9  ;;  %2645 = vmatprep.subr.bf16.mxu0 %v4051_v16  ;;  %v284_v9 = vld [vmem:[%s5425_s0 + $0x7d8] sm:$0xff]  ;;  %v4085_v16 = vld [vmem:[#allocation2 + $0x6a0] ss:$8 sps:$4 sm:$0xff]  }
  0xea   :  { %2758 = vmatprep.subr.bf16.mxu1 %v4054_v17  ;;  %2477 = vmatprep.mubr.bf16.mxu0 %v362_v19  ;;  %v412_v15 = vpack.c.bf16 %v284_v9, %v268_v8  ;;  %v4088_v17 = vld [vmem:[#allocation2 + $0x7a0] ss:$8 sps:$4 sm:$0xff]  }
  0xeb   :  { %2590 = vmatprep.mubr.bf16.mxu1 %v364_v20  ;;  %v281_v19 = vld [vmem:[%s5425_s0 + $0x7c0] sm:$0xff]  ;;  %v267_v20 = vld [vmem:[%s5425_s0 + $0x750] sm:$0xff] }
  0xec   :  { %2646 = vmatpush1.bf16.msra.mxu0 %v4049_v18  ;;  %v265_v18 = vld [vmem:[%s5425_s0 + $0x740] sm:$0xff] }
  0xed   :  { %2759 = vmatpush1.bf16.msra.mxu1 %v4052_v21  ;;  %2647 = vmatprep.subr.bf16.mxu0 %v4057_v26  ;;  %v283_v21 = vld [vmem:[%s5425_s0 + $0x7d0] sm:$0xff]  ;;  %v409_v25 = vpack.c.bf16 %v281_v19, %v265_v18 }
  0xee   :  { %2760 = vmatprep.subr.bf16.mxu1 %v4060_v27  ;;  %v411_v26 = vpack.c.bf16 %v283_v21, %v267_v20  ;;  %v62_v27 = vld [vmem:[%s5425_s0 + $0xe8] sm:$0xff]  ;;  %v144_v21 = vld [vmem:[%s5425_s0 + $0x378] sm:$0xff] }
  0xef   :  { %2478 = vmatmul.mubr.bf16.gmra.mxu0 %v361_v32  ;;  %v4099_v32 = vld [vmem:[#allocation2 + $0x684] ss:$8 sps:$4 sm:$0xff]   ;;  %v302_v35 = vpack.c.bf16 %v62_v27, %v46_v24 }
  0xf0   :  { %2591 = vmatmul.mubr.bf16.gmra.mxu1 %v363_v33  ;;  %2648 = vmatpush2.bf16.msra.mxu0 %v4055_v28  ;;  %v48_v28 = vld [vmem:[%s5425_s0 + $0x78] sm:$0xff]  ;;  %v4102_v33 = vld [vmem:[#allocation2 + $0x784] ss:$8 sps:$4 sm:$0xff]  }
  0xf1   :  { %2761 = vmatpush2.bf16.msra.mxu1 %v4058_v29  ;;  %2649 = vmatprep.subr.bf16.mxu0 %v4063_v36  ;;  %v64_v29 = vld [vmem:[%s5425_s0 + $0xf8] sm:$0xff]  ;;  %v158_v20 = vld [vmem:[%s5425_s0 + $0x3e8] sm:$0xff] }
  0xf2   :  { %2762 = vmatprep.subr.bf16.mxu1 %v4066_v37  ;;  %2487 = vmatprep.mubr.bf16.mxu0 %v378_v39  ;;  %v304_v36 = vpack.c.bf16 %v64_v29, %v48_v28  ;;  %v4100_v37 = vld [vmem:[#allocation2 + $0x780] ss:$8 sps:$4 sm:$0xff]  }
  0xf3   :  { %2600 = vmatprep.mubr.bf16.mxu1 %v380_v40  ;;  %v61_v39 = vld [vmem:[%s5425_s0 + $0xe0] sm:$0xff]  ;;  %v47_v40 = vld [vmem:[%s5425_s0 + $0x70] sm:$0xff] }
  0xf4   :  { %2650 = vmatpush2.bf16.msra.mxu0 %v4061_v38  ;;  %v45_v38 = vld [vmem:[%s5425_s0 + $0x60] sm:$0xff] }
  0xf5   :  { %2763 = vmatpush2.bf16.msra.mxu1 %v4064_v41  ;;  %2651 = vmatprep.subr.bf16.mxu0 %v4069_v46  ;;  %v63_v41 = vld [vmem:[%s5425_s0 + $0xf0] sm:$0xff]  ;;  %v301_v46 = vpack.c.bf16 %v61_v39, %v45_v38 }
  0xf6   :  { %2764 = vmatprep.subr.bf16.mxu1 %v4072_v47  ;;  %v303_v47 = vpack.c.bf16 %v63_v41, %v47_v40  ;;  %v143_v39 = vld [vmem:[%s5425_s0 + $0x370] sm:$0xff]  ;;  %v174_v41 = vld [vmem:[%s5425_s0 + $0x468] sm:$0xff] }
  0xf7   :  { %2488 = vmatmul.mubr.bf16.gmra.mxu0 %v377_v52  ;;  %v79_v52 = vld [vmem:[%s5425_s0 + $0x170] sm:$0xff] }
  0xf8   :  { %2601 = vmatmul.mubr.bf16.gmra.mxu1 %v379_v53  ;;  %2652 = vmatpush2.bf16.msra.mxu0 %v4067_v48  ;;  %v318_v48 = vpack.c.bf16 %v94_v43, %v78_v42  ;;  %v95_v53 = vld [vmem:[%s5425_s0 + $0x1f0] sm:$0xff] }
  0xf9   :  { %2765 = vmatpush2.bf16.msra.mxu1 %v4070_v49  ;;  %2653 = vmatprep.subr.bf16.mxu0 %v4075_v56  ;;  %v320_v49 = vpack.c.bf16 %v96_v45, %v80_v44  ;;  %v110_v56 = vld [vmem:[%s5425_s0 + $0x268] sm:$0xff]  ;;  %v159_v40 = vld [vmem:[%s5425_s0 + $0x3f0] sm:$0xff]  ;;  %v176_v45 = vld [vmem:[%s5425_s0 + $0x478] sm:$0xff] }
  0xfa   :  { %2766 = vmatprep.subr.bf16.mxu1 %v4078_v57  ;;  %2497 = vmatprep.mubr.bf16.mxu0 %v394_v58  ;;  %v126_v57 = vld [vmem:[%s5425_s0 + $0x2e8] sm:$0xff]  ;;  %v112_v58 = vld [vmem:[%s5425_s0 + $0x278] sm:$0xff] }
  0xfb   :  { %2610 = vmatprep.mubr.bf16.mxu1 %v396_v59  ;;  %v128_v59 = vld [vmem:[%s5425_s0 + $0x2f8] sm:$0xff]  ;;  %v190_v44 = vld [vmem:[%s5425_s0 + $0x4e8] sm:$0xff] }
  0xfc   :  { %2654 = vmatpush2.bf16.msra.mxu0 %v4073_v60 }
  0xfd   :  { %2767 = vmatpush2.bf16.msra.mxu1 %v4076_v61  ;;  %2655 = vmatprep.subr.bf16.mxu0 %v4081_v2  ;;  %v317_v2 = vpack.c.bf16 %v93_v51, %v77_v50  ;;  %v351_v51 = vpack.c.bf16 %v159_v40, %v143_v39  ;;  %v256_v39 = vld [vmem:[%s5425_s0 + $0x6f8] sm:$0xff] }
  0xfe   :  { %2768 = vmatprep.subr.bf16.mxu1 %v4084_v3  ;;  %v319_v3 = vpack.c.bf16 %v95_v53, %v79_v52  ;;  %v366_v53 = vpack.c.bf16 %v190_v44, %v174_v41  ;;  %v4103_v41 = vld [vmem:[%s5427_s2 + $0x78] sm:$0xff]  }
  0xff   :  { %2498 = vmatmul.mubr.bf16.gmra.mxu0 %v393_v5  ;;  %v334_v5 = vpack.c.bf16 %v126_v57, %v110_v56 }
 0x100   :  { %2611 = vmatmul.mubr.bf16.gmra.mxu1 %v395_v6  ;;  %2656 = vmatpush2.bf16.msra.mxu0 %v4079_v10  ;;  %v336_v6 = vpack.c.bf16 %v128_v59, %v112_v58 }
 0x101   :  { %2769 = vmatpush2.bf16.msra.mxu1 %v4082_v11  ;;  %2657 = vmatprep.subr.bf16.mxu0 %v4087_v12  ;;  %v109_v12 = vld [vmem:[%s5425_s0 + $0x260] sm:$0xff] }
 0x102   :  { %2770 = vmatprep.subr.bf16.mxu1 %v4090_v13  ;;  %2507 = vmatprep.mubr.bf16.mxu0 %v410_v14  ;;  %v125_v13 = vld [vmem:[%s5425_s0 + $0x2e0] sm:$0xff] }
 0x103   :  { %2620 = vmatprep.mubr.bf16.mxu1 %v412_v15  ;;  %v111_v15 = vld [vmem:[%s5425_s0 + $0x270] sm:$0xff] }
 0x104   :  { %2658 = vmatpush2.bf16.msra.mxu0 %v4085_v16  ;;  %v127_v16 = vld [vmem:[%s5425_s0 + $0x2f0] sm:$0xff] }
 0x105   :  { %2771 = vmatpush2.bf16.msra.mxu1 %v4088_v17  ;;  %2659 = vmatprep.subr.bf16.mxu0 %v4093_v22  ;;  %v142_v17 = vld [vmem:[%s5425_s0 + $0x368] sm:$0xff]  ;;  %v160_v22 = vld [vmem:[%s5425_s0 + $0x3f8] sm:$0xff]  ;;  %v335_v27 = vpack.c.bf16 %v127_v16, %v111_v15 }
 0x106   :  { %2772 = vmatprep.subr.bf16.mxu1 %v4096_v23  ;;  %v350_v29 = vpack.c.bf16 %v158_v20, %v142_v17 }
 0x107   :  { %2508 = vmatmul.mubr.bf16.gmra.mxu0 %v409_v25 }
 0x108   :  { %2621 = vmatmul.mubr.bf16.gmra.mxu1 %v411_v26  ;;  %2660 = vmatpush2.bf16.msra.mxu0 %v4091_v30  ;;  %v333_v26 = vpack.c.bf16 %v125_v13, %v109_v12  ;;  %v352_v30 = vpack.c.bf16 %v160_v22, %v144_v21 }
 0x109   :  { %2773 = vmatpush2.bf16.msra.mxu1 %v4094_v31  ;;  %2661 = vmatprep.subr.bf16.mxu0 %v4099_v32 }
 0x10a   :  { %2774 = vmatprep.subr.bf16.mxu1 %v4102_v33  ;;  %2663 = vmatprep.mubr.bf16.mxu0 %v302_v35 }
 0x10b   :  { %2776 = vmatprep.mubr.bf16.mxu1 %v304_v36  ;;  %v141_v36 = vld [vmem:[%s5425_s0 + $0x360] sm:$0xff] }
 0x10c   :  { %2662 = vmatpush2.bf16.msra.mxu0 %v4097_v34 }
 0x10d   :  { %2775 = vmatpush2.bf16.msra.mxu1 %v4100_v37  ;;  %v157_v37 = vld [vmem:[%s5425_s0 + $0x3e0] sm:$0xff]  ;;  %3635 = vmatprep.subr.bf16.mxu0 %v4103_v41 }
 0x10e   :  { %v349_v50 = vpack.c.bf16 %v157_v37, %v141_v36  ;;  %v254_v36 = vld [vmem:[%s5425_s0 + $0x6e8] sm:$0xff]  ;;  %v240_v37 = vld [vmem:[%s5425_s0 + $0x678] sm:$0xff]  ;;  %3699 = vmatprep.subr.bf16.mxu1 %v4103_v41 }
 0x10f   :  { %v1987_v54 = vpop.f32.mrf.mxu0  ;;  %2664 = vmatmul.mubr.bf16.vlgmr.msra.gmra.mxu0 %v301_v46  ;;  %v192_v46 = vld [vmem:[%s5425_s0 + $0x4f8] sm:$0xff]  ;;  %v4107_v41 = vld [vmem:[%s5427_s2 + $0x68] sm:$0xff]  }
 0x110   :  { %v2100_v55 = vpop.f32.mrf.mxu1  ;;  %2777 = vmatmul.mubr.bf16.vlgmr.msra.gmra.mxu1 %v303_v47  ;;  %2673 = vmatprep.mubr.bf16.mxu0 %v318_v48 }
 0x111   :  { %v4831_v60 = vadd.f32 %v2100_v55, %v1987_v54  ;;  %2786 = vmatprep.mubr.bf16.mxu1 %v320_v49  ;;  %v1989_v61 = vpop.f32.mrf.mxu0  ;;  %v368_v54 = vpack.c.bf16 %v192_v46, %v176_v45 }
 0x112   :  { %v2102_v62 = vpop.f32.mrf.mxu1 }
 0x113   :  { %v4833_v63 = vadd.f32 %v2102_v62, %v1989_v61  ;;  %v1991_v0 = vpop.f32.mrf.mxu0  ;;  %v173_v61 = vld [vmem:[%s5425_s0 + $0x460] sm:$0xff] }
 0x114   :  { %v2104_v1 = vpop.f32.mrf.mxu1  ;;  %v189_v62 = vld [vmem:[%s5425_s0 + $0x4e0] sm:$0xff] }
 0x115   :  { %v4835_v4 = vadd.f32 %v2104_v1, %v1991_v0  ;;  %v1993_v7 = vpop.f32.mrf.mxu0  ;;  %v175_v1 = vld [vmem:[%s5425_s0 + $0x470] sm:$0xff]  ;;  %v365_v15 = vpack.c.bf16 %v189_v62, %v173_v61 }
 0x116   :  { %v2106_v8 = vpop.f32.mrf.mxu1  ;;  %v239_v61 = vld [vmem:[%s5425_s0 + $0x670] sm:$0xff] }
 0x117   :  { %v4837_v9 = vadd.f32 %v2106_v8, %v1993_v7  ;;  %v1997_v10 = vpop.f32.mrf.mxu0  ;;  %2674 = vmatmul.mubr.bf16.gmra.mxu0 %v317_v2  ;;  %v191_v2 = vld [vmem:[%s5425_s0 + $0x4f0] sm:$0xff]  ;;  %v222_v7 = vld [vmem:[%s5425_s0 + $0x5e8] sm:$0xff]  ;;  %v208_v8 = vld [vmem:[%s5425_s0 + $0x578] sm:$0xff] }
 0x118   :  { %v2110_v11 = vpop.f32.mrf.mxu1  ;;  %2787 = vmatmul.mubr.bf16.gmra.mxu1 %v319_v3  ;;  %2683 = vmatprep.mubr.bf16.mxu0 %v334_v5  ;;  %v206_v3 = vld [vmem:[%s5425_s0 + $0x568] sm:$0xff]  ;;  %v367_v16 = vpack.c.bf16 %v191_v2, %v175_v1  ;;  %v255_v62 = vld [vmem:[%s5425_s0 + $0x6f0] sm:$0xff] }
 0x119   :  { %v4845_v14 = vadd.f32 %v2110_v11, %v1997_v10  ;;  %2796 = vmatprep.mubr.bf16.mxu1 %v336_v6  ;;  %v1999_v18 = vpop.f32.mrf.mxu0  ;;  %v224_v10 = vld [vmem:[%s5425_s0 + $0x5f8] sm:$0xff]  ;;  %v270_v1 = vld [vmem:[%s5425_s0 + $0x768] sm:$0xff] }
 0x11a   :  { %v2112_v19 = vpop.f32.mrf.mxu1 }
 0x11b   :  { %v4865_v23 = vadd.f32 %v2112_v19, %v1999_v18  ;;  %v2001_v24 = vpop.f32.mrf.mxu0  ;;  %v382_v18 = vpack.c.bf16 %v222_v7, %v206_v3  ;;  %v384_v19 = vpack.c.bf16 %v224_v10, %v208_v8  ;;  %v288_v7 = vld [vmem:[%s5425_s0 + $0x7f8] sm:$0xff]  ;;  %v4105_v10 = vld [vmem:[%s5427_s2 + $0x70] sm:$0xff]  }
 0x11c   :  { %v2114_v25 = vpop.f32.mrf.mxu1 }
 0x11d   :  { %v4867_v28 = vadd.f32 %v2114_v25, %v2001_v24  ;;  %v2003_v31 = vpop.f32.mrf.mxu0 }
 0x11e   :  { %v2116_v32 = vpop.f32.mrf.mxu1 }
 0x11f   :  { %v4869_v33 = vadd.f32 %v2116_v32, %v2003_v31  ;;  %v2007_v34 = vpop.f32.mrf.mxu0  ;;  %2684 = vmatmul.mubr.bf16.gmra.mxu0 %v333_v26  ;;  %v205_v26 = vld [vmem:[%s5425_s0 + $0x560] sm:$0xff]  ;;  %v223_v31 = vld [vmem:[%s5425_s0 + $0x5f0] sm:$0xff]  ;;  %v238_v32 = vld [vmem:[%s5425_s0 + $0x668] sm:$0xff] }
 0x120   :  { %v2120_v35 = vpop.f32.mrf.mxu1  ;;  %2797 = vmatmul.mubr.bf16.gmra.mxu1 %v335_v27  ;;  %2693 = vmatprep.mubr.bf16.mxu0 %v350_v29  ;;  %v221_v27 = vld [vmem:[%s5425_s0 + $0x5e0] sm:$0xff] }
 0x121   :  { %v4877_v38 = vadd.f32 %v2120_v35, %v2007_v34  ;;  %2806 = vmatprep.mubr.bf16.mxu1 %v352_v30  ;;  %v2009_v42 = vpop.f32.mrf.mxu0  ;;  %v207_v30 = vld [vmem:[%s5425_s0 + $0x570] sm:$0xff]  ;;  %v381_v45 = vpack.c.bf16 %v221_v27, %v205_v26 }
 0x122   :  { %v2122_v43 = vpop.f32.mrf.mxu1  ;;  %v383_v46 = vpack.c.bf16 %v223_v31, %v207_v30  ;;  %v269_v30 = vld [vmem:[%s5425_s0 + $0x760] sm:$0xff] }
 0x123   :  { %v4897_v47 = vadd.f32 %v2122_v43, %v2009_v42  ;;  %v2011_v48 = vpop.f32.mrf.mxu0  ;;  %v4104_v42 = vld [vmem:[%s5427_s2 + $0x38] sm:$0xff]  }
 0x124   :  { %v2124_v49 = vpop.f32.mrf.mxu1  ;;  %3636 = vmatpush3.bf16.msra.mxu0 %v4104_v42  ;;  %3707 = vmatpush3.bf16.msra.mxu1 %v4104_v42  ;;  %v4108_v42 = vld [vmem:[%s5427_s2 + $0x28] sm:$0xff]  }
 0x125   :  { %v4899_v52 = vadd.f32 %v2124_v49, %v2011_v48  ;;  %v2013_v55 = vpop.f32.mrf.mxu0  ;;  %v398_v49 = vpack.c.bf16 %v254_v36, %v238_v32  ;;  %3637 = vmatprep.subr.bf16.mxu0 %v4105_v10  ;;  %3700 = vmatprep.subr.bf16.mxu1 %v4105_v10  ;;  %v285_v32 = vld [vmem:[%s5425_s0 + $0x7e0] sm:$0xff] }
 0x126   :  { %v2126_v56 = vpop.f32.mrf.mxu1 }
 0x127   :  { %v4901_v57 = vadd.f32 %v2126_v56, %v2013_v55  ;;  %v2017_v58 = vpop.f32.mrf.mxu0  ;;  %2694 = vmatmul.mubr.bf16.gmra.mxu0 %v349_v50  ;;  %v400_v50 = vpack.c.bf16 %v256_v39, %v240_v37  ;;  %v237_v56 = vld [vmem:[%s5425_s0 + $0x660] sm:$0xff] }
 0x128   :  { %v2130_v59 = vpop.f32.mrf.mxu1  ;;  %2807 = vmatmul.mubr.bf16.gmra.mxu1 %v351_v51  ;;  %2703 = vmatprep.mubr.bf16.mxu0 %v366_v53 }
 0x129   :  { %v4909_v0 = vadd.f32 %v2130_v59, %v2017_v58  ;;  %2816 = vmatprep.mubr.bf16.mxu1 %v368_v54  ;;  %v2019_v5 = vpop.f32.mrf.mxu0  ;;  %v253_v58 = vld [vmem:[%s5425_s0 + $0x6e0] sm:$0xff] }
 0x12a   :  { %v2132_v6 = vpop.f32.mrf.mxu1 }
 0x12b   :  { %v4929_v11 = vadd.f32 %v2132_v6, %v2019_v5  ;;  %v2021_v12 = vpop.f32.mrf.mxu0  ;;  %v286_v5 = vld [vmem:[%s5425_s0 + $0x7e8] sm:$0xff]  ;;  %v272_v6 = vld [vmem:[%s5425_s0 + $0x778] sm:$0xff] }
 0x12c   :  { %v2134_v13 = vpop.f32.mrf.mxu1 }
 0x12d   :  { %v4931_v17 = vadd.f32 %v2134_v13, %v2021_v12  ;;  %v2023_v20 = vpop.f32.mrf.mxu0  ;;  %v4106_v12 = vld [vmem:[%s5427_s2 + $0x30] sm:$0xff]  }
 0x12e   :  { %v2136_v21 = vpop.f32.mrf.mxu1  ;;  %3638 = vmatpush3.bf16.msra.mxu0 %v4106_v12  ;;  %3708 = vmatpush3.bf16.msra.mxu1 %v4106_v12 }
 0x12f   :  { %v4933_v22 = vadd.f32 %v2136_v21, %v2023_v20  ;;  %v2027_v24 = vpop.f32.mrf.mxu0  ;;  %2704 = vmatmul.mubr.bf16.gmra.mxu0 %v365_v15  ;;  %v414_v20 = vpack.c.bf16 %v286_v5, %v270_v1  ;;  %v416_v21 = vpack.c.bf16 %v288_v7, %v272_v6  ;;  %3639 = vmatprep.subr.bf16.mxu0 %v4107_v41  ;;  %v4109_v1 = vld [vmem:[%s5427_s2 + $0x60] sm:$0xff]  }
 0x130   :  { %v2140_v25 = vpop.f32.mrf.mxu1  ;;  %2817 = vmatmul.mubr.bf16.gmra.mxu1 %v367_v16  ;;  %2713 = vmatprep.mubr.bf16.mxu0 %v382_v18  ;;  %v397_v16 = vpack.c.bf16 %v253_v58, %v237_v56  ;;  %v399_v18 = vpack.c.bf16 %v255_v62, %v239_v61 }
 0x131   :  { %v4941_v29 = vadd.f32 %v2140_v25, %v2027_v24  ;;  %2826 = vmatprep.mubr.bf16.mxu1 %v384_v19  ;;  %v2029_v34 = vpop.f32.mrf.mxu0  ;;  %3701 = vmatprep.subr.bf16.mxu1 %v4107_v41 }
 0x132   :  { %v2142_v35 = vpop.f32.mrf.mxu1  ;;  %3640 = vmatpush3.bf16.msra.mxu0 %v4108_v42  ;;  %3709 = vmatpush3.bf16.msra.mxu1 %v4108_v42 }
 0x133   :  { %v4961_v40 = vadd.f32 %v2142_v35, %v2029_v34  ;;  %v2031_v43 = vpop.f32.mrf.mxu0  ;;  %v271_v34 = vld [vmem:[%s5425_s0 + $0x770] sm:$0xff]  ;;  %3641 = vmatprep.subr.bf16.mxu0 %v4109_v1  ;;  %3702 = vmatprep.subr.bf16.mxu1 %v4109_v1 }
 0x134   :  { %v2144_v44 = vpop.f32.mrf.mxu1  ;;  %v287_v35 = vld [vmem:[%s5425_s0 + $0x7f0] sm:$0xff] }
 0x135   :  { %v4969_v48 = vadd.f32 %v2144_v44, %v2031_v43  ;;  %v4971_v51 = vpop.f32.mrf.mxu0 }
 0x136   :  { %v4973_v53 = vpop.f32.mrf.mxu1 }
 0x137   :  { %v2037_v54 = vpop.f32.mrf.mxu0  ;;  %2714 = vmatmul.mubr.bf16.gmra.mxu0 %v381_v45  ;;  %v413_v45 = vpack.c.bf16 %v285_v32, %v269_v30 }
 0x138   :  { %v2150_v55 = vpop.f32.mrf.mxu1  ;;  %2827 = vmatmul.mubr.bf16.gmra.mxu1 %v383_v46  ;;  %2723 = vmatprep.mubr.bf16.mxu0 %v398_v49  ;;  %v415_v46 = vpack.c.bf16 %v287_v35, %v271_v34  ;;  %v4114_v34 = vld [vmem:[%s5427_s2 + $0x10] sm:$0xff]  }
 0x139   :  { %v4981_v59 = vadd.f32 %v2150_v55, %v2037_v54  ;;  %2836 = vmatprep.mubr.bf16.mxu1 %v400_v50  ;;  %v2039_v2 = vpop.f32.mrf.mxu0 }
 0x13a   :  { %v2152_v3 = vpop.f32.mrf.mxu1 }
 0x13b   :  { %v5001_v8 = vadd.f32 %v2152_v3, %v2039_v2  ;;  %v2041_v13 = vpop.f32.mrf.mxu0  ;;  %v4110_v3 = vld [vmem:[%s5427_s2 + $0x20] sm:$0xff]  }
 0x13c   :  { %v2154_v15 = vpop.f32.mrf.mxu1  ;;  %3642 = vmatpush3.bf16.msra.mxu0 %v4110_v3  ;;  %3710 = vmatpush3.bf16.msra.mxu1 %v4110_v3 }
 0x13d   :  { %v5009_v19 = vadd.f32 %v2154_v15, %v2041_v13  ;;  %v5011_v24 = vpop.f32.mrf.mxu0  ;;  %v4111_v13 = vld [vmem:[%s5427_s2 + $0x58] sm:$0xff]  }
 0x13e   :  { %v5013_v25 = vpop.f32.mrf.mxu1  ;;  %v4112_v15 = vld [vmem:[%s5427_s2 + $0x18] sm:$0xff]   ;;  %3643 = vmatprep.subr.bf16.mxu0 %v4111_v13  ;;  %3703 = vmatprep.subr.bf16.mxu1 %v4111_v13 }
 0x13f   :  { %v2047_v26 = vpop.f32.mrf.mxu0  ;;  %2724 = vmatmul.mubr.bf16.gmra.mxu0 %v397_v16 }
 0x140   :  { %v2160_v27 = vpop.f32.mrf.mxu1  ;;  %2837 = vmatmul.mubr.bf16.gmra.mxu1 %v399_v18  ;;  %2733 = vmatprep.mubr.bf16.mxu0 %v414_v20 }
 0x141   :  { %v5018_v31 = vadd.f32 %v2160_v27, %v2047_v26  ;;  %2846 = vmatprep.mubr.bf16.mxu1 %v416_v21  ;;  %v2049_v36 = vpop.f32.mrf.mxu0  ;;  %3644 = vmatpush3.bf16.msra.mxu0 %v4112_v15  ;;  %v4113_v27 = vld [vmem:[%s5427_s2 + $0x50] sm:$0xff]  }
 0x142   :  { %v2162_v37 = vpop.f32.mrf.mxu1  ;;  %3711 = vmatpush3.bf16.msra.mxu1 %v4112_v15  ;;  %3645 = vmatprep.subr.bf16.mxu0 %v4113_v27 }
 0x143   :  { %v5029_v39 = vadd.f32 %v2162_v37, %v2049_v36  ;;  %v2051_v43 = vpop.f32.mrf.mxu0  ;;  %3704 = vmatprep.subr.bf16.mxu1 %v4113_v27 }
 0x144   :  { %v2164_v44 = vpop.f32.mrf.mxu1 }
 0x145   :  { %v5037_v49 = vadd.f32 %v2164_v44, %v2051_v43  ;;  %v5039_v50 = vpop.f32.mrf.mxu0  ;;  %3646 = vmatpush3.bf16.msra.mxu0 %v4114_v34 }
 0x146   :  { %v5041_v54 = vpop.f32.mrf.mxu1  ;;  %3712 = vmatpush3.bf16.msra.mxu1 %v4114_v34 }
 0x147   :  { %v2057_v55 = vpop.f32.mrf.mxu0  ;;  %2734 = vmatmul.mubr.bf16.gmra.mxu0 %v413_v45  ;;  %v4116_v45 = vld [vmem:[%s5427_s2 + $0x8] sm:$0xff]  }
 0x148   :  { %v2170_v56 = vpop.f32.mrf.mxu1  ;;  %2847 = vmatmul.mubr.bf16.gmra.mxu1 %v415_v46 }
 0x149   :  { %v5043_v58 = vadd.f32 %v2170_v56, %v2057_v55  ;;  %v2059_v61 = vpop.f32.mrf.mxu0 }
 0x14a   :  { %v2172_v62 = vpop.f32.mrf.mxu1 }
 0x14b   :  { %v5048_v2 = vadd.f32 %v2172_v62, %v2059_v61  ;;  %v2061_v5 = vpop.f32.mrf.mxu0 }
 0x14c   :  { %v2174_v6 = vpop.f32.mrf.mxu1 }
 0x14d   :  { %v5053_v7 = vadd.f32 %v2174_v6, %v2061_v5  ;;  %v5055_v10 = vpop.f32.mrf.mxu0  ;;  %v4118_v5 = vld [vmem:[%s5427_s2] sm:$0xff]  }
 0x14e   :  { %v5057_v12 = vpop.f32.mrf.mxu1 }
 0x14f   :  { %v2213_v16 = vpop.f32.mrf.mxu0 }
 0x150   :  { %v2326_v18 = vpop.f32.mrf.mxu1  ;;  %v2214_v20 = vadd.f32 %v2213_v16, %v4831_v60 }
 0x151   :  { %v2215_v21 = vpop.f32.mrf.mxu0 }
 0x152   :  { %v2328_v26 = vpop.f32.mrf.mxu1  ;;  %v5069_v30 = vadd.f32 %v2326_v18, %v2214_v20  ;;  %v2216_v32 = vadd.f32 %v2215_v21, %v4833_v63  ;;  %v4115_v63 = vld [vmem:[%s5427_s2 + $0x48] sm:$0xff]  }
 0x153   :  { %v2217_v35 = vpop.f32.mrf.mxu0  ;;  %3647 = vmatprep.subr.bf16.mxu0 %v4115_v63  ;;  %3705 = vmatprep.subr.bf16.mxu1 %v4115_v63 }
 0x154   :  { %v2330_v36 = vpop.f32.mrf.mxu1  ;;  %v5075_v60 = vadd.f32 %v2328_v26, %v2216_v32  ;;  %v2218_v37 = vadd.f32 %v2217_v35, %v4835_v4  ;;  %3648 = vmatpush3.bf16.msra.mxu0 %v4116_v45  ;;  %3713 = vmatpush3.bf16.msra.mxu1 %v4116_v45 }
 0x155   :  { %v2219_v41 = vpop.f32.mrf.mxu0 }
 0x156   :  { %v2332_v42 = vpop.f32.mrf.mxu1  ;;  %v5081_v43 = vadd.f32 %v2330_v36, %v2218_v37  ;;  %v2220_v44 = vadd.f32 %v2219_v41, %v4837_v9  ;;  %v4117_v9 = vld [vmem:[%s5427_s2 + $0x40] sm:$0xff]  }
 0x157   :  { %v2223_v46 = vpop.f32.mrf.mxu0  ;;  %3649 = vmatprep.subr.bf16.mxu0 %v4117_v9  ;;  %3706 = vmatprep.subr.bf16.mxu1 %v4117_v9 }
 0x158   :  { %v2336_v55 = vpop.f32.mrf.mxu1  ;;  %v5087_v4 = vadd.f32 %v2332_v42, %v2220_v44  ;;  %v2224_v56 = vadd.f32 %v2223_v46, %v4845_v14  ;;  %3650 = vmatpush3.bf16.msra.mxu0 %v4118_v5  ;;  %3714 = vmatpush3.bf16.msra.mxu1 %v4118_v5 }
 0x159   :  { %v2225_v61 = vpop.f32.mrf.mxu0 }
 0x15a   :  { %v2338_v62 = vpop.f32.mrf.mxu1  ;;  %v5093_v1 = vadd.f32 %v2336_v55, %v2224_v56  ;;  %v2226_v3 = vadd.f32 %v2225_v61, %v4865_v23 }
 0x15b   :  { %v2227_v6 = vpop.f32.mrf.mxu0 }
 0x15c   :  { %v2340_v13 = vpop.f32.mrf.mxu1  ;;  %v5099_v14 = vadd.f32 %v2338_v62, %v2226_v3  ;;  %v2228_v15 = vadd.f32 %v2227_v6, %v4867_v28 }
 0x15d   :  { %v2229_v16 = vpop.f32.mrf.mxu0 }
 0x15e   :  { %v2342_v18 = vpop.f32.mrf.mxu1  ;;  %v5102_v20 = vadd.f32 %v2340_v13, %v2228_v15  ;;  %v2230_v23 = vadd.f32 %v2229_v16, %v4869_v33 }
 0x15f   :  { %v2233_v21 = vpop.f32.mrf.mxu0 }
 0x160   :  { %v2346_v26 = vpop.f32.mrf.mxu1  ;;  %v5105_v27 = vadd.f32 %v2342_v18, %v2230_v23  ;;  %v2234_v32 = vadd.f32 %v2233_v21, %v4877_v38 }
 0x161   :  { %v2235_v34 = vpop.f32.mrf.mxu0 }
 0x162   :  { %v2348_v35 = vpop.f32.mrf.mxu1  ;;  %v5108_v36 = vadd.f32 %v2346_v26, %v2234_v32  ;;  %v2236_v28 = vadd.f32 %v2235_v34, %v4897_v47 }
 0x163   :  { %v2237_v37 = vpop.f32.mrf.mxu0 }
 0x164   :  { %v2350_v41 = vpop.f32.mrf.mxu1  ;;  %v5111_v42 = vadd.f32 %v2348_v35, %v2236_v28  ;;  %v2238_v63 = vadd.f32 %v2237_v37, %v4899_v52  ;;  %v2147_v37 = vadd.f32 %v4973_v53, %v4971_v51 }
 0x165   :  { %v2239_v44 = vpop.f32.mrf.mxu0 }
 0x166   :  { %v2352_v33 = vpop.f32.mrf.mxu1  ;;  %v5114_v45 = vadd.f32 %v2350_v41, %v2238_v63  ;;  %v2240_v46 = vadd.f32 %v2239_v44, %v4901_v57 }
 0x167   :  { %v2243_v55 = vpop.f32.mrf.mxu0 }
 0x168   :  { %v2356_v38 = vpop.f32.mrf.mxu1  ;;  %v5117_v56 = vadd.f32 %v2352_v33, %v2240_v46  ;;  %v2244_v61 = vadd.f32 %v2243_v55, %v4909_v0 }
 0x169   :  { %v2245_v62 = vpop.f32.mrf.mxu0 }
 0x16a   :  { %v2358_v47 = vpop.f32.mrf.mxu1  ;;  %v5120_v9 = vadd.f32 %v2356_v38, %v2244_v61  ;;  %v2246_v3 = vadd.f32 %v2245_v62, %v4929_v11 }
 0x16b   :  { %v2247_v5 = vpop.f32.mrf.mxu0 }
 0x16c   :  { %v2360_v52 = vpop.f32.mrf.mxu1  ;;  %v5123_v6 = vadd.f32 %v2358_v47, %v2246_v3  ;;  %v2248_v13 = vadd.f32 %v2247_v5, %v4931_v17 }
 0x16d   :  { %v2249_v15 = vpop.f32.mrf.mxu0 }
 0x16e   :  { %v2362_v57 = vpop.f32.mrf.mxu1  ;;  %v5126_v16 = vadd.f32 %v2360_v52, %v2248_v13  ;;  %v2250_v18 = vadd.f32 %v2249_v15, %v4933_v22 }
 0x16f   :  { %v2253_v23 = vpop.f32.mrf.mxu0 }
 0x170   :  { %v2366_v0 = vpop.f32.mrf.mxu1  ;;  %v5129_v21 = vadd.f32 %v2362_v57, %v2250_v18  ;;  %v2254_v26 = vadd.f32 %v2253_v23, %v4941_v29 }
 0x171   :  { %v2255_v32 = vpop.f32.mrf.mxu0 }
 0x172   :  { %v2368_v11 = vpop.f32.mrf.mxu1  ;;  %v5132_v34 = vadd.f32 %v2366_v0, %v2254_v26  ;;  %v2256_v35 = vadd.f32 %v2255_v32, %v4961_v40 }
 0x173   :  { %v2257_v28 = vpop.f32.mrf.mxu0 }
 0x174   :  { %v2370_v17 = vpop.f32.mrf.mxu1  ;;  %v5137_v41 = vadd.f32 %v2368_v11, %v2256_v35  ;;  %v2258_v22 = vadd.f32 %v2257_v28, %v4969_v48  ;;  %v2157_v48 = vadd.f32 %v5013_v25, %v5011_v24 }
 0x175   :  { %v2259_v63 = vpop.f32.mrf.mxu0 }
 0x176   :  { %v2372_v44 = vpop.f32.mrf.mxu1  ;;  %v5140_v33 = vadd.f32 %v2370_v17, %v2258_v22  ;;  %v2260_v29 = vadd.f32 %v2259_v63, %v2147_v37 }
 0x177   :  { %v2263_v46 = vpop.f32.mrf.mxu0 }
 0x178   :  { %v2376_v55 = vpop.f32.mrf.mxu1  ;;  %v5142_v38 = vadd.f32 %v2372_v44, %v2260_v29  ;;  %v2264_v40 = vadd.f32 %v2263_v46, %v4981_v59 }
 0x179   :  { %v2265_v61 = vpop.f32.mrf.mxu0 }
 0x17a   :  { %v2378_v62 = vpop.f32.mrf.mxu1  ;;  %v5145_v47 = vadd.f32 %v2376_v55, %v2264_v40  ;;  %v2266_v51 = vadd.f32 %v2265_v61, %v5001_v8 }
 0x17b   :  { %v2267_v53 = vpop.f32.mrf.mxu0 }
 0x17c   :  { %v2380_v3 = vpop.f32.mrf.mxu1  ;;  %v5150_v5 = vadd.f32 %v2378_v62, %v2266_v51  ;;  %v2268_v52 = vadd.f32 %v2267_v53, %v5009_v19  ;;  %v2167_v19 = vadd.f32 %v5041_v54, %v5039_v50 }
 0x17d   :  { %v2269_v13 = vpop.f32.mrf.mxu0 }
 0x17e   :  { %v2382_v15 = vpop.f32.mrf.mxu1  ;;  %v5153_v57 = vadd.f32 %v2380_v3, %v2268_v52  ;;  %v2270_v59 = vadd.f32 %v2269_v13, %v2157_v48 }
 0x17f   :  { %v2273_v18 = vpop.f32.mrf.mxu0 }
 0x180   :  { %v2386_v23 = vpop.f32.mrf.mxu1  ;;  %v5155_v0 = vadd.f32 %v2382_v15, %v2270_v59  ;;  %v2274_v8 = vadd.f32 %v2273_v18, %v5018_v31 }
 0x181   :  { %v2275_v26 = vpop.f32.mrf.mxu0 }
 0x182   :  { %v2388_v32 = vpop.f32.mrf.mxu1  ;;  %v5158_v11 = vadd.f32 %v2386_v23, %v2274_v8  ;;  %v2276_v24 = vadd.f32 %v2275_v26, %v5029_v39 }
 0x183   :  { %v2277_v25 = vpop.f32.mrf.mxu0 }
 0x184   :  { %v2390_v35 = vpop.f32.mrf.mxu1  ;;  %v5163_v28 = vadd.f32 %v2388_v32, %v2276_v24  ;;  %v2278_v17 = vadd.f32 %v2277_v25, %v5037_v49  ;;  %v2177_v49 = vadd.f32 %v5057_v12, %v5055_v10 }
 0x185   :  { %v2279_v37 = vpop.f32.mrf.mxu0 }
 0x186   :  { %v2392_v22 = vpop.f32.mrf.mxu1  ;;  %v5166_v63 = vadd.f32 %v2390_v35, %v2278_v17  ;;  %v2280_v31 = vadd.f32 %v2279_v37, %v2167_v19 }
 0x187   :  { %v2283_v44 = vpop.f32.mrf.mxu0 }
 0x188   :  { %5430 = vst [vmem:[#allocation8_spill] sm:$0xff] %v5166_v63  ;;  %v2396_v29 = vpop.f32.mrf.mxu1  ;;  %v5168_v46 = vadd.f32 %v2392_v22, %v2280_v31  ;;  %v2284_v39 = vadd.f32 %v2283_v44, %v5043_v58 }
 0x189   :  { %v2285_v55 = vpop.f32.mrf.mxu0 }
 0x18a   :  { %5431 = vst [vmem:[#allocation9_spill] sm:$0xff] %v5168_v46  ;;  %v2398_v40 = vpop.f32.mrf.mxu1  ;;  %v5171_v61 = vadd.f32 %v2396_v29, %v2284_v39  ;;  %v2286_v50 = vadd.f32 %v2285_v55, %v5048_v2 }
 0x18b   :  { %v2287_v54 = vpop.f32.mrf.mxu0 }
 0x18c   :  { %v2400_v62 = vpop.f32.mrf.mxu1  ;;  %v5176_v51 = vadd.f32 %v2398_v40, %v2286_v50  ;;  %v2288_v53 = vadd.f32 %v2287_v54, %v5053_v7 }
 0x18d   :  { %v2289_v3 = vpop.f32.mrf.mxu0 }
 0x18e   :  { %v2402_v48 = vpop.f32.mrf.mxu1  ;;  %v5179_v52 = vadd.f32 %v2400_v62, %v2288_v53  ;;  %v2290_v58 = vadd.f32 %v2289_v3, %v2177_v49 }
 0x18f   :  { %v2439_v13 = vpop.f32.mrf.mxu0 }
 0x190   :  { %5432 = vst [vmem:[#allocation10_spill] sm:$0xff] %v5179_v52  ;;  %v2552_v15 = vpop.f32.mrf.mxu1  ;;  %v5181_v59 = vadd.f32 %v2402_v48, %v2290_v58  ;;  %v2440_v2 = vadd.f32 %v2439_v13, %v5069_v30 }
 0x191   :  { %v2441_v18 = vpop.f32.mrf.mxu0 }
 0x192   :  { %5433 = vst [vmem:[#allocation11_spill] sm:$0xff] %v5181_v59  ;;  %v2554_v23 = vpop.f32.mrf.mxu1  ;;  %v5184_v8 = vadd.f32 %v2552_v15, %v2440_v2  ;;  %v2442_v10 = vadd.f32 %v2441_v18, %v5075_v60 }
 0x193   :  { %v5187_v12 = vpop.f32.mrf.mxu0 }
 0x194   :  { %v5189_v7 = vpop.f32.mrf.mxu1  ;;  %v5191_v26 = vadd.f32 %v2554_v23, %v2442_v10 }
 0x195   :  { %v5193_v32 = vpop.f32.mrf.mxu0 }
 0x196   :  { %v5195_v24 = vpop.f32.mrf.mxu1 }
 0x197   :  { %v2449_v25 = vpop.f32.mrf.mxu0 }
 0x198   :  { %v2562_v35 = vpop.f32.mrf.mxu1  ;;  %v2450_v30 = vadd.f32 %v2449_v25, %v5093_v1 }
 0x199   :  { %v2451_v19 = vpop.f32.mrf.mxu0 }
 0x19a   :  { %v2564_v17 = vpop.f32.mrf.mxu1  ;;  %v5198_v37 = vadd.f32 %v2562_v35, %v2450_v30  ;;  %v2452_v60 = vadd.f32 %v2451_v19, %v5099_v14 }
 0x19b   :  { %v5201_v22 = vpop.f32.mrf.mxu0 }
 0x19c   :  { %v5203_v31 = vpop.f32.mrf.mxu1  ;;  %v5205_v44 = vadd.f32 %v2564_v17, %v2452_v60 }
 0x19d   :  { %v5207_v29 = vpop.f32.mrf.mxu0 }
 0x19e   :  { %v5209_v39 = vpop.f32.mrf.mxu1 }
 0x19f   :  { %v2459_v55 = vpop.f32.mrf.mxu0 }
 0x1a0   :  { %v2572_v40 = vpop.f32.mrf.mxu1  ;;  %v2460_v1 = vadd.f32 %v2459_v55, %v5108_v36 }
 0x1a1   :  { %v2461_v50 = vpop.f32.mrf.mxu0 }
 0x1a2   :  { %v2574_v54 = vpop.f32.mrf.mxu1  ;;  %v5212_v62 = vadd.f32 %v2572_v40, %v2460_v1  ;;  %v2462_v14 = vadd.f32 %v2461_v50, %v5111_v42 }
 0x1a3   :  { %v5215_v49 = vpop.f32.mrf.mxu0 }
 0x1a4   :  { %v5217_v53 = vpop.f32.mrf.mxu1  ;;  %v5219_v3 = vadd.f32 %v2574_v54, %v2462_v14 }
 0x1a5   :  { %v5221_v48 = vpop.f32.mrf.mxu0 }
 0x1a6   :  { %v5223_v58 = vpop.f32.mrf.mxu1 }
 0x1a7   :  { %v2469_v13 = vpop.f32.mrf.mxu0 }
 0x1a8   :  { %v2582_v15 = vpop.f32.mrf.mxu1  ;;  %v2470_v36 = vadd.f32 %v2469_v13, %v5120_v9 }
 0x1a9   :  { %v2471_v2 = vpop.f32.mrf.mxu0 }
 0x1aa   :  { %v2584_v18 = vpop.f32.mrf.mxu1  ;;  %v5226_v23 = vadd.f32 %v2582_v15, %v2470_v36  ;;  %v2472_v42 = vadd.f32 %v2471_v2, %v5123_v6 }
 0x1ab   :  { %v5229_v10 = vpop.f32.mrf.mxu0 }
 0x1ac   :  { %v5231_v25 = vpop.f32.mrf.mxu1  ;;  %v5233_v35 = vadd.f32 %v2584_v18, %v2472_v42 }
 0x1ad   :  { %v5235_v30 = vpop.f32.mrf.mxu0 }
 0x1ae   :  { %v5237_v19 = vpop.f32.mrf.mxu1 }
 0x1af   :  { %v2479_v17 = vpop.f32.mrf.mxu0 }
 0x1b0   :  { %v2592_v60 = vpop.f32.mrf.mxu1  ;;  %v2480_v9 = vadd.f32 %v2479_v17, %v5132_v34 }
 0x1b1   :  { %v2481_v55 = vpop.f32.mrf.mxu0 }
 0x1b2   :  { %v2594_v40 = vpop.f32.mrf.mxu1  ;;  %v5240_v1 = vadd.f32 %v2592_v60, %v2480_v9  ;;  %v2482_v6 = vadd.f32 %v2481_v55, %v5137_v41 }
 0x1b3   :  { %v5243_v50 = vpop.f32.mrf.mxu0 }
 0x1b4   :  { %v5245_v54 = vpop.f32.mrf.mxu1  ;;  %v5247_v14 = vadd.f32 %v2594_v40, %v2482_v6 }
 0x1b5   :  { %v5249_v13 = vpop.f32.mrf.mxu0 }
 0x1b6   :  { %v5251_v15 = vpop.f32.mrf.mxu1 }
 0x1b7   :  { %v2489_v36 = vpop.f32.mrf.mxu0 }
 0x1b8   :  { %v2602_v2 = vpop.f32.mrf.mxu1  ;;  %v2490_v34 = vadd.f32 %v2489_v36, %v5145_v47 }
 0x1b9   :  { %v2491_v18 = vpop.f32.mrf.mxu0 }
 0x1ba   :  { %v2604_v42 = vpop.f32.mrf.mxu1  ;;  %v5254_v17 = vadd.f32 %v2602_v2, %v2490_v34  ;;  %v2492_v41 = vadd.f32 %v2491_v18, %v5150_v5 }
 0x1bb   :  { %v5257_v60 = vpop.f32.mrf.mxu0 }
 0x1bc   :  { %v5259_v9 = vpop.f32.mrf.mxu1  ;;  %v5261_v55 = vadd.f32 %v2604_v42, %v2492_v41 }
 0x1bd   :  { %5434 = vst [vmem:[#allocation12_spill] sm:$0xff] %v5259_v9  ;;  %v5263_v40 = vpop.f32.mrf.mxu0 }
 0x1be   :  { %5435 = vst [vmem:[#allocation13_spill] sm:$0xff] %v5261_v55  ;;  %v5265_v6 = vpop.f32.mrf.mxu1 }
 0x1bf   :  { %5436 = vst [vmem:[#allocation14_spill] sm:$0xff] %v5265_v6  ;;  %v2499_v59 = vpop.f32.mrf.mxu0 }
 0x1c0   :  { %v2612_v52 = vpop.f32.mrf.mxu1  ;;  %v2500_v47 = vadd.f32 %v2499_v59, %v5158_v11 }
 0x1c1   :  { %v2501_v36 = vpop.f32.mrf.mxu0 }
 0x1c2   :  { %v2614_v46 = vpop.f32.mrf.mxu1  ;;  %v5268_v2 = vadd.f32 %v2612_v52, %v2500_v47  ;;  %v2502_v5 = vadd.f32 %v2501_v36, %v5163_v28 }
 0x1c3   :  { %v5271_v34 = vpop.f32.mrf.mxu0 }
 0x1c4   :  { %v5273_v18 = vpop.f32.mrf.mxu1  ;;  %v5275_v42 = vadd.f32 %v2614_v46, %v2502_v5 }
 0x1c5   :  { %5437 = vst [vmem:[#allocation15_spill] sm:$0xff] %v5273_v18  ;;  %v5277_v41 = vpop.f32.mrf.mxu0 }
 0x1c6   :  { %5438 = vst [vmem:[#allocation16_spill] sm:$0xff] %v5275_v42  ;;  %v5279_v63 = vpop.f32.mrf.mxu1 }
 0x1c7   :  { %5439 = vst [vmem:[#allocation17_spill] sm:$0xff] %v5279_v63  ;;  %v2509_v6 = vpop.f32.mrf.mxu0  ;;  %v2444_v63 = vadd.f32 %v5187_v12, %v5081_v43  ;;  %v2454_v43 = vadd.f32 %v5201_v22, %v5102_v20 }
 0x1c8   :  { %v2622_v55 = vpop.f32.mrf.mxu1  ;;  %v2510_v11 = vadd.f32 %v2509_v6, %v5171_v61 }
 0x1c9   :  { %v2511_v59 = vpop.f32.mrf.mxu0 }
 0x1ca   :  { %v2624_v9 = vpop.f32.mrf.mxu1  ;;  %v5282_v52 = vadd.f32 %v2622_v55, %v2510_v11  ;;  %v2512_v28 = vadd.f32 %v2511_v59, %v5176_v51  ;;  %v2446_v55 = vadd.f32 %v5193_v32, %v5087_v4 }
 0x1cb   :  { %v5285_v47 = vpop.f32.mrf.mxu0 }
 0x1cc   :  { %5440 = vst [vmem:[#allocation18_spill] sm:$0xff] %v5282_v52  ;;  %5441 = vst [vmem:[#allocation19_spill] sm:$0xff] %v5285_v47  ;;  %v5287_v36 = vpop.f32.mrf.mxu1  ;;  %v5289_v46 = vadd.f32 %v2624_v9, %v2512_v28 }
 0x1cd   :  { %5442 = vst [vmem:[#allocation20_spill] sm:$0xff] %v5287_v36  ;;  %v5291_v5 = vpop.f32.mrf.mxu0  ;;  %v2557_v36 = vadd.f32 %v5189_v7, %v2444_v63 }
 0x1ce   :  { %5443 = vst [vmem:[#allocation21_spill] sm:$0xff] %v5289_v46  ;;  %5444 = vst [vmem:[#allocation22_spill] sm:$0xff] %v5291_v5  ;;  %v5293_v42 = vpop.f32.mrf.mxu1 }
 0x1cf   :  { %5445 = vst [vmem:[#allocation23_spill] sm:$0xff] %v5293_v42  ;;  %v2665_v61 = vpop.f32.mrf.mxu0  ;;  %v2559_v42 = vadd.f32 %v5195_v24, %v2446_v55 }
 0x1d0   :  { %v2778_v6 = vpop.f32.mrf.mxu1  ;;  %v2666_v51 = vadd.f32 %v2665_v61, %v5184_v8  ;;  %v2456_v61 = vadd.f32 %v5207_v29, %v5105_v27 }
 0x1d1   :  { %v2667_v11 = vpop.f32.mrf.mxu0 }
 0x1d2   :  { %v2780_v59 = vpop.f32.mrf.mxu1  ;;  %v2668_v9 = vadd.f32 %v2667_v11, %v5191_v26  ;;  %v2779_v52 = vadd.f32 %v2778_v6, %v2666_v51  ;;  %v2569_v27 = vadd.f32 %v5209_v39, %v2456_v61 }
 0x1d3   :  { %v2669_v28 = vpop.f32.mrf.mxu0 }
 0x1d4   :  { %v2782_v46 = vpop.f32.mrf.mxu1  ;;  %v2670_v5 = vadd.f32 %v2669_v28, %v2557_v36  ;;  %v2781_v4 = vadd.f32 %v2780_v59, %v2668_v9  ;;  %v2857_v26 = vmax.f32 %v2779_v52, 0.0  ;;  %v2567_v36 = vadd.f32 %v5203_v31, %v2454_v43 }
 0x1d5   :  { %v2671_v12 = vpop.f32.mrf.mxu0 }
 0x1d6   :  { %v2784_v47 = vpop.f32.mrf.mxu1  ;;  %v2783_v32 = vadd.f32 %v2782_v46, %v2670_v5  ;;  %v2672_v8 = vadd.f32 %v2671_v12, %v2559_v42  ;;  %v2858_v20 = vmax.f32 %v2781_v4, 0.0 }
 0x1d7   :  { %v2675_v63 = vpop.f32.mrf.mxu0 }
 0x1d8   :  { %v2788_v7 = vpop.f32.mrf.mxu1  ;;  %v2859_v11 = vmax.f32 %v2783_v32, 0.0  ;;  %v2785_v18 = vadd.f32 %v2784_v47, %v2672_v8  ;;  %v2676_v24 = vadd.f32 %v2675_v63, %v5198_v37  ;;  %v2464_v47 = vadd.f32 %v5215_v49, %v5114_v45 }
 0x1d9   :  { %v2677_v6 = vpop.f32.mrf.mxu0 }
 0x1da   :  { %v2790_v55 = vpop.f32.mrf.mxu1  ;;  %v2889_v22 = vpack.c.bf16 %v2859_v11, %v2857_v26  ;;  %v2860_v51 = vmax.f32 %v2785_v18, 0.0  ;;  %v2678_v46 = vadd.f32 %v2677_v6, %v5205_v44  ;;  %v2789_v59 = vadd.f32 %v2788_v7, %v2676_v24 }
 0x1db   :  { %v2679_v42 = vpop.f32.mrf.mxu0  ;;  %v2466_v18 = vadd.f32 %v5221_v48, %v5117_v56  ;;  %v2577_v61 = vadd.f32 %v5217_v53, %v2464_v47 }
 0x1dc   :  { %v2792_v5 = vpop.f32.mrf.mxu1  ;;  %v2890_v29 = vpack.c.bf16 %v2860_v51, %v2858_v20  ;;  %v2680_v52 = vadd.f32 %v2679_v42, %v2567_v36  ;;  %v2791_v31 = vadd.f32 %v2790_v55, %v2678_v46  ;;  %v2861_v4 = vmax.f32 %v2789_v59, 0.0 }
 0x1dd   :  { %v2681_v37 = vpop.f32.mrf.mxu0  ;;  %v2579_v56 = vadd.f32 %v5223_v58, %v2466_v18  ;;  %v2474_v20 = vadd.f32 %v5229_v10, %v5126_v16  ;;  %v2476_v42 = vadd.f32 %v5235_v30, %v5129_v21 }
 0x1de   :  { %v2794_v9 = vpop.f32.mrf.mxu1  ;;  %v2793_v28 = vadd.f32 %v2792_v5, %v2680_v52  ;;  %v2682_v43 = vadd.f32 %v2681_v37, %v2569_v27  ;;  %3065 = vmatprep.mubr.bf16.mxu0 %v2890_v29  ;;  %v2862_v63 = vmax.f32 %v2791_v31, 0.0 }
 0x1df   :  { %v2685_v44 = vpop.f32.mrf.mxu0  ;;  %3066 = vmatmul.mubr.bf16.vlgmr.msra.gmra.mxu0 %v2889_v22  ;;  %v2587_v52 = vadd.f32 %v5231_v25, %v2474_v20  ;;  %v2589_v21 = vadd.f32 %v5237_v19, %v2476_v42  ;;  %v2494_v20 = vadd.f32 %v5257_v60, %v5153_v57 }
 0x1e0   :  { %v2798_v12 = vpop.f32.mrf.mxu1  ;;  %v2863_v39 = vmax.f32 %v2793_v28, 0.0  ;;  %v2795_v32 = vadd.f32 %v2794_v9, %v2682_v43  ;;  %v2686_v8 = vadd.f32 %v2685_v44, %v5212_v62 }
 0x1e1   :  { %v2687_v45 = vpop.f32.mrf.mxu0 }
 0x1e2   :  { %v2800_v49 = vpop.f32.mrf.mxu1  ;;  %v2891_v7 = vpack.c.bf16 %v2863_v39, %v2861_v4  ;;  %v2864_v26 = vmax.f32 %v2795_v32, 0.0  ;;  %v2688_v11 = vadd.f32 %v2687_v45, %v5219_v3  ;;  %v2799_v6 = vadd.f32 %v2798_v12, %v2686_v8 }
 0x1e3   :  { %v2689_v24 = vpop.f32.mrf.mxu0  ;;  %v2484_v12 = vadd.f32 %v5243_v50, %v5140_v33  ;;  %v2486_v8 = vadd.f32 %v5249_v13, %v5142_v38 }
 0x1e4   :  { %v2802_v36 = vpop.f32.mrf.mxu1  ;;  %v2892_v48 = vpack.c.bf16 %v2864_v26, %v2862_v63  ;;  %v2690_v55 = vadd.f32 %v2689_v24, %v2577_v61  ;;  %v2801_v53 = vadd.f32 %v2800_v49, %v2688_v11  ;;  %v2865_v27 = vmax.f32 %v2799_v6, 0.0 }
 0x1e5   :  { %v2691_v62 = vpop.f32.mrf.mxu0  ;;  %v2599_v38 = vadd.f32 %v5251_v15, %v2486_v8 }
 0x1e6   :  { %v2804_v22 = vpop.f32.mrf.mxu1  ;;  %v2803_v51 = vadd.f32 %v2802_v36, %v2690_v55  ;;  %v2692_v46 = vadd.f32 %v2691_v62, %v2579_v56  ;;  %3073 = vmatprep.mubr.bf16.mxu0 %v2892_v48  ;;  %v2866_v47 = vmax.f32 %v2801_v53, 0.0 }
 0x1e7   :  { %v2695_v3 = vpop.f32.mrf.mxu0  ;;  %3074 = vmatmul.mubr.bf16.gmra.mxu0 %v2891_v7  ;;  %v2597_v7 = vadd.f32 %v5245_v54, %v2484_v12 }
 0x1e8   :  { %v2808_v5 = vpop.f32.mrf.mxu1  ;;  %v2867_v58 = vmax.f32 %v2803_v51, 0.0  ;;  %v2805_v29 = vadd.f32 %v2804_v22, %v2692_v46  ;;  %v2696_v59 = vadd.f32 %v2695_v3, %v5226_v23  ;;  %v2496_v51 = vadd.f32 %v5263_v40, %v5155_v0  ;;  %v5448_v0 = vld [vmem:[#allocation14_spill] sm:$0xff] }
 0x1e9   :  { %v2697_v16 = vpop.f32.mrf.mxu0 }
 0x1ea   :  { %v2810_v10 = vpop.f32.mrf.mxu1  ;;  %v2893_v37 = vpack.c.bf16 %v2867_v58, %v2865_v27  ;;  %v2868_v9 = vmax.f32 %v2805_v29, 0.0  ;;  %v2698_v31 = vadd.f32 %v2697_v16, %v5233_v35  ;;  %v2809_v18 = vadd.f32 %v2808_v5, %v2696_v59  ;;  %v5446_v27 = vld [vmem:[#allocation12_spill] sm:$0xff]  ;;  %v5447_v16 = vld [vmem:[#allocation13_spill] sm:$0xff] }
 0x1eb   :  { %v2699_v28 = vpop.f32.mrf.mxu0  ;;  %v2607_v58 = vadd.f32 %v5446_v27, %v2494_v20  ;;  %v2609_v40 = vadd.f32 %v5448_v0, %v2496_v51 }
 0x1ec   :  { %v2812_v43 = vpop.f32.mrf.mxu1  ;;  %v2894_v30 = vpack.c.bf16 %v2868_v9, %v2866_v47  ;;  %v2700_v44 = vadd.f32 %v2699_v28, %v2587_v52  ;;  %v2811_v25 = vadd.f32 %v2810_v10, %v2698_v31  ;;  %v2869_v45 = vmax.f32 %v2809_v18, 0.0 }
 0x1ed   :  { %v2701_v23 = vpop.f32.mrf.mxu0 }
 0x1ee   :  { %v2814_v4 = vpop.f32.mrf.mxu1  ;;  %v2813_v39 = vadd.f32 %v2812_v43, %v2700_v44  ;;  %v2702_v32 = vadd.f32 %v2701_v23, %v2589_v21  ;;  %3081 = vmatprep.mubr.bf16.mxu0 %v2894_v30  ;;  %v2870_v26 = vmax.f32 %v2811_v25, 0.0  ;;  %v5449_v43 = vld [vmem:[#allocation8_spill] sm:$0xff]  ;;  %v5450_v23 = vld [vmem:[#allocation9_spill] sm:$0xff] }
 0x1ef   :  { %v2705_v35 = vpop.f32.mrf.mxu0  ;;  %3082 = vmatmul.mubr.bf16.gmra.mxu0 %v2893_v37  ;;  %v2504_v21 = vadd.f32 %v5271_v34, %v5449_v43 }
 0x1f0   :  { %v2818_v61 = vpop.f32.mrf.mxu1  ;;  %v2871_v19 = vmax.f32 %v2813_v39, 0.0  ;;  %v2815_v49 = vadd.f32 %v2814_v4, %v2702_v32  ;;  %v2706_v63 = vadd.f32 %v2705_v35, %v5240_v1  ;;  %v2506_v4 = vadd.f32 %v5277_v41, %v5450_v23  ;;  %v5453_v41 = vld [vmem:[#allocation17_spill] sm:$0xff] }
 0x1f1   :  { %v2707_v33 = vpop.f32.mrf.mxu0 }
 0x1f2   :  { %v2820_v50 = vpop.f32.mrf.mxu1  ;;  %v2895_v11 = vpack.c.bf16 %v2871_v19, %v2869_v45  ;;  %v2872_v24 = vmax.f32 %v2815_v49, 0.0  ;;  %v2708_v36 = vadd.f32 %v2707_v33, %v5247_v14  ;;  %v2819_v6 = vadd.f32 %v2818_v61, %v2706_v63  ;;  %v5451_v45 = vld [vmem:[#allocation15_spill] sm:$0xff] }
 0x1f3   :  { %v2709_v56 = vpop.f32.mrf.mxu0  ;;  %v2617_v19 = vadd.f32 %v5451_v45, %v2504_v21 }
 0x1f4   :  { %v2822_v48 = vpop.f32.mrf.mxu1  ;;  %v2896_v13 = vpack.c.bf16 %v2872_v24, %v2870_v26  ;;  %v2710_v55 = vadd.f32 %v2709_v56, %v2597_v7  ;;  %v2821_v54 = vadd.f32 %v2820_v50, %v2708_v36  ;;  %v2873_v42 = vmax.f32 %v2819_v6, 0.0  ;;  %v5452_v50 = vld [vmem:[#allocation16_spill] sm:$0xff]  ;;  %v5455_v6 = vld [vmem:[#allocation19_spill] sm:$0xff] }
 0x1f5   :  { %v2711_v1 = vpop.f32.mrf.mxu0  ;;  %v2619_v36 = vadd.f32 %v5453_v41, %v2506_v4 }
 0x1f6   :  { %v2824_v62 = vpop.f32.mrf.mxu1  ;;  %v2823_v22 = vadd.f32 %v2822_v48, %v2710_v55  ;;  %v2712_v53 = vadd.f32 %v2711_v1, %v2599_v38  ;;  %3089 = vmatprep.mubr.bf16.mxu0 %v2896_v13  ;;  %v2874_v29 = vmax.f32 %v2821_v54, 0.0  ;;  %v5454_v13 = vld [vmem:[#allocation10_spill] sm:$0xff] }
 0x1f7   :  { %v2715_v14 = vpop.f32.mrf.mxu0  ;;  %3090 = vmatmul.mubr.bf16.gmra.mxu0 %v2895_v11  ;;  %v2514_v55 = vadd.f32 %v5455_v6, %v5454_v13 }
 0x1f8   :  { %v2828_v46 = vpop.f32.mrf.mxu1  ;;  %v2875_v15 = vmax.f32 %v2823_v22, 0.0  ;;  %v2825_v3 = vadd.f32 %v2824_v62, %v2712_v53  ;;  %v2716_v5 = vadd.f32 %v2715_v14, %v5254_v17  ;;  %v5456_v22 = vld [vmem:[#allocation11_spill] sm:$0xff]  ;;  %v5457_v53 = vld [vmem:[#allocation22_spill] sm:$0xff] }
 0x1f9   :  { %v2717_v57 = vpop.f32.mrf.mxu0  ;;  %v2516_v51 = vadd.f32 %v5457_v53, %v5456_v22 }
 0x1fa   :  { %v2830_v60 = vpop.f32.mrf.mxu1  ;;  %v2897_v59 = vpack.c.bf16 %v2875_v15, %v2873_v42  ;;  %v2876_v52 = vmax.f32 %v2825_v3, 0.0  ;;  %v2718_v10 = vadd.f32 %v2717_v57, %v5447_v16  ;;  %v2829_v31 = vadd.f32 %v2828_v46, %v2716_v5  ;;  %v5458_v5 = vld [vmem:[#allocation18_spill] sm:$0xff] }
 0x1fb   :  { %v2719_v47 = vpop.f32.mrf.mxu0 }
 0x1fc   :  { %v2832_v37 = vpop.f32.mrf.mxu1  ;;  %v2898_v9 = vpack.c.bf16 %v2876_v52, %v2874_v29  ;;  %v2720_v28 = vadd.f32 %v2719_v47, %v2607_v58  ;;  %v2831_v18 = vadd.f32 %v2830_v60, %v2718_v10  ;;  %v2877_v32 = vmax.f32 %v2829_v31, 0.0  ;;  %v5459_v58 = vld [vmem:[#allocation20_spill] sm:$0xff]  ;;  %v5460_v10 = vld [vmem:[#allocation21_spill] sm:$0xff] }
 0x1fd   :  { %v2721_v17 = vpop.f32.mrf.mxu0  ;;  %v2627_v57 = vadd.f32 %v5459_v58, %v2514_v55 }
 0x1fe   :  { %v2834_v30 = vpop.f32.mrf.mxu1  ;;  %v2833_v44 = vadd.f32 %v2832_v37, %v2720_v28  ;;  %v2722_v12 = vadd.f32 %v2721_v17, %v2609_v40  ;;  %3097 = vmatprep.mubr.bf16.mxu1 %v2898_v9  ;;  %v2878_v63 = vmax.f32 %v2831_v18, 0.0  ;;  %v5461_v40 = vld [vmem:[#allocation23_spill] sm:$0xff] }
 0x1ff   :  { %v2725_v25 = vpop.f32.mrf.mxu0  ;;  %3098 = vmatmul.mubr.bf16.vlgmr.msra.gmra.mxu1 %v2897_v59  ;;  %v2629_v9 = vadd.f32 %v5461_v40, %v2516_v51 }
 0x200   :  { %v2838_v39 = vpop.f32.mrf.mxu1  ;;  %v2879_v8 = vmax.f32 %v2833_v44, 0.0  ;;  %v2835_v35 = vadd.f32 %v2834_v30, %v2722_v12  ;;  %v2726_v61 = vadd.f32 %v2725_v25, %v5268_v2 }
 0x201   :  { %v2727_v34 = vpop.f32.mrf.mxu0 }
 0x202   :  { %v2840_v49 = vpop.f32.mrf.mxu1  ;;  %v2899_v7 = vpack.c.bf16 %v2879_v8, %v2877_v32  ;;  %v2880_v33 = vmax.f32 %v2835_v35, 0.0  ;;  %v2728_v26 = vadd.f32 %v2727_v34, %v5452_v50  ;;  %v2839_v48 = vadd.f32 %v2838_v39, %v2726_v61  ;;  %v5362_v34 = vld [vmem:[%s5428_s3] ss:$0 sm:$0xff]  ;;  %s4166_s3 = smov [#allocation5]  }
 0x203   :  { %v2729_v11 = vpop.f32.mrf.mxu0  ;;  %s3353_s25 = sshll.u32 %s4166_s3, 4  ;;  %s3354_s25 = int_to_ptr.vmem [resolvable:$true] %s3353_s25 }
 0x204   :  { %v2842_v24 = vpop.f32.mrf.mxu1  ;;  %v2900_v56 = vpack.c.bf16 %v2880_v33, %v2878_v63  ;;  %v2730_v38 = vadd.f32 %v2729_v11, %v2617_v19  ;;  %v2841_v1 = vadd.f32 %v2840_v49, %v2728_v26  ;;  %v2881_v42 = vmax.f32 %v2839_v48, 0.0  ;;  %s4139_s26 = scalar_lea.vmem %s3354_s25, 16  ;;  %s4143_s27 = scalar_lea.vmem %s3354_s25, 32 }
 0x205   :  { %v2731_v2 = vpop.f32.mrf.mxu0  ;;  %p4140_p5 = scmp.ne.s32.totalorder %s3354_s25, %s4139_s26  ;;  %p4144_p6 = scmp.lt.s32.totalorder %s3354_s25, %s3354_s25 }
 0x206   :  { %v2844_v20 = vpop.f32.mrf.mxu1  ;;  %v2843_v62 = vadd.f32 %v2842_v24, %v2730_v38  ;;  %v2732_v54 = vadd.f32 %v2731_v2, %v2619_v36  ;;  %3105 = vmatprep.mubr.bf16.mxu1 %v2900_v56  ;;  %v2882_v59 = vmax.f32 %v2841_v1, 0.0  ;;  %p4145_p7 = scmp.lt.s32.totalorder %s4143_s27, %s4139_s26 }
 0x207   :  { %v2735_v14 = vpop.f32.mrf.mxu0  ;;  %3106 = vmatmul.mubr.bf16.gmra.mxu1 %v2899_v7 }
 0x208   :  { %v2848_v46 = vpop.f32.mrf.mxu1  ;;  %v2883_v15 = vmax.f32 %v2843_v62, 0.0  ;;  %v2845_v3 = vadd.f32 %v2844_v20, %v2732_v54  ;;  %v2736_v27 = vadd.f32 %v2735_v14, %v5458_v5  ;;  %p4146_p8 = por %p4145_p7, %p4144_p6 }
 0x209   :  { %v2737_v60 = vpop.f32.mrf.mxu0 }
 0x20a   :  { %v2850_v29 = vpop.f32.mrf.mxu1  ;;  %v2901_v52 = vpack.c.bf16 %v2883_v15, %v2881_v42  ;;  %v2884_v16 = vmax.f32 %v2845_v3, 0.0  ;;  %v2738_v47 = vadd.f32 %v2737_v60, %v5460_v10  ;;  %v2849_v28 = vadd.f32 %v2848_v46, %v2736_v27  ;;  %p4147_p9 = pnand %p4146_p8, %p4140_p5 }
 0x20b   :  { %v2739_v37 = vpop.f32.mrf.mxu0 }
 0x20c   :  { %v2852_v0 = vpop.f32.mrf.mxu1  ;;  %v2902_v31 = vpack.c.bf16 %v2884_v16, %v2882_v59  ;;  %v2740_v43 = vadd.f32 %v2739_v37, %v2627_v57  ;;  %v2851_v17 = vadd.f32 %v2850_v29, %v2738_v47  ;;  %v2885_v12 = vmax.f32 %v2849_v28, 0.0 }
 0x20d   :  { %v2741_v21 = vpop.f32.mrf.mxu0 }
 0x20e   :  { %v2853_v30 = vadd.f32 %v2852_v0, %v2740_v43  ;;  %v2742_v18 = vadd.f32 %v2741_v21, %v2629_v9  ;;  %3113 = vmatprep.mubr.bf16.mxu1 %v2902_v31  ;;  %v2854_v44 = vpop.f32.mrf.mxu1  ;;  %v2886_v25 = vmax.f32 %v2851_v17, 0.0 }
 0x20f   :  { %3114 = vmatmul.mubr.bf16.gmra.mxu1 %v2901_v52 }
 0x210   :  { %v2887_v23 = vmax.f32 %v2853_v30, 0.0  ;;  %v2855_v4 = vadd.f32 %v2854_v44, %v2742_v18 }
 0x212   :  { %v2903_v39 = vpack.c.bf16 %v2887_v23, %v2885_v12  ;;  %v2888_v32 = vmax.f32 %v2855_v4, 0.0 }
 0x214   :  { %v2904_v8 = vpack.c.bf16 %v2888_v32, %v2886_v25 }
 0x216   :  { %3121 = vmatprep.mubr.bf16.mxu1 %v2904_v8 }
 0x217   :  { %3122 = vmatmul.mubr.bf16.gmra.mxu1 %v2903_v39 }
 0x29f   :  { %v3651_v35 = vpop.f32.mrf.mxu0 }
 0x2a1   :  { %v3652_v61 = vpop.f32.mrf.mxu0 }
 0x2a2   :  { %v3653_v45 = vadd.f32 %v3652_v61, %v3651_v35 }
 0x2a3   :  { %v3654_v19 = vpop.f32.mrf.mxu0 }
 0x2a4   :  { %v3130_v49 = vmax.f32 %v3653_v45, 0.0 }
 0x2a5   :  { %v3655_v63 = vpop.f32.mrf.mxu0 }
 0x2a6   :  { %v3656_v7 = vadd.f32 %v3655_v63, %v3654_v19  ;;  %v3153_v33 = vmul.f32 %v5362_v34, %v3130_v49 }
 0x2a7   :  { %v3657_v50 = vpop.f32.mrf.mxu0 }
 0x2a8   :  { %v3131_v26 = vmax.f32 %v3656_v7, 0.0  ;;  %v3170_v11 = vsel %vm3169_vm0, %v3153_v33, 0.0 }
 0x2a9   :  { %v3658_v24 = vpop.f32.mrf.mxu0  ;;  %3171 = vadd.xlane.f32.xlu0 %v3170_v11 }
 0x2aa   :  { %v3659_v41 = vadd.f32 %v3658_v24, %v3657_v50  ;;  %v3154_v36 = vmul.f32 %v5362_v34, %v3131_v26 }
 0x2ab   :  { %v3660_v56 = vpop.f32.mrf.mxu0 }
 0x2ac   :  { %v3132_v48 = vmax.f32 %v3659_v41, 0.0  ;;  %v3173_v38 = vsel %vm3169_vm0, %v3154_v36, 0.0 }
 0x2ad   :  { %v3661_v13 = vpop.f32.mrf.mxu0  ;;  %3174 = vadd.xlane.f32.xlu0 %v3173_v38 }
 0x2ae   :  { %v3662_v6 = vadd.f32 %v3661_v13, %v3660_v56  ;;  %v3155_v55 = vmul.f32 %v5362_v34, %v3132_v48 }
 0x2af   :  { %v3663_v2 = vpop.f32.mrf.mxu0 }
 0x2b0   :  { %v3133_v20 = vmax.f32 %v3662_v6, 0.0  ;;  %v3176_v1 = vsel %vm3169_vm0, %v3155_v55, 0.0 }
 0x2b1   :  { %v3664_v62 = vpop.f32.mrf.mxu0  ;;  %3177 = vadd.xlane.f32.xlu1 %v3176_v1 }
 0x2b2   :  { %v3665_v54 = vadd.f32 %v3664_v62, %v3663_v2  ;;  %v3156_v22 = vmul.f32 %v5362_v34, %v3133_v20 }
 0x2b3   :  { %v3666_v53 = vpop.f32.mrf.mxu0 }
 0x2b4   :  { %v3134_v51 = vmax.f32 %v3665_v54, 0.0  ;;  %v3179_v14 = vsel %vm3169_vm0, %v3156_v22, 0.0 }
 0x2b5   :  { %v3667_v46 = vpop.f32.mrf.mxu0  ;;  %3180 = vadd.xlane.f32.xlu1 %v3179_v14 }
 0x2b6   :  { %v3668_v42 = vadd.f32 %v3667_v46, %v3666_v53  ;;  %v3157_v15 = vmul.f32 %v5362_v34, %v3134_v51 }
 0x2b7   :  { %v3669_v3 = vpop.f32.mrf.mxu0 }
 0x2b8   :  { %v3135_v5 = vmax.f32 %v3668_v42, 0.0  ;;  %v3182_v27 = vsel %vm3169_vm0, %v3157_v15, 0.0 }
 0x2b9   :  { %v3670_v58 = vpop.f32.mrf.mxu0  ;;  %3183 = vadd.xlane.f32.xlu0 %v3182_v27 }
 0x2ba   :  { %v3671_v57 = vadd.f32 %v3670_v58, %v3669_v3  ;;  %v3158_v60 = vmul.f32 %v5362_v34, %v3135_v5  ;;  %v3234_v58 = vlaneseq }
 0x2bb   :  { %v3672_v29 = vpop.f32.mrf.mxu0 }
 0x2bc   :  { %v3136_v59 = vmax.f32 %v3671_v57, 0.0  ;;  %v3185_v52 = vsel %vm3169_vm0, %v3158_v60, 0.0 }
 0x2bd   :  { %v3673_v16 = vpop.f32.mrf.mxu0  ;;  %3186 = vadd.xlane.f32.xlu1 %v3185_v52 }
 0x2be   :  { %v3674_v10 = vadd.f32 %v3673_v16, %v3672_v29  ;;  %v3159_v47 = vmul.f32 %v5362_v34, %v3136_v59  ;;  %v3235_v29 = vand.u32 127, %v3234_v58 }
 0x2bf   :  { %v3675_v37 = vpop.f32.mrf.mxu1 }
 0x2c0   :  { %v3137_v0 = vmax.f32 %v3674_v10, 0.0  ;;  %v3188_v40 = vsel %vm3169_vm0, %v3159_v47, 0.0  ;;  %v3240_v52 = vadd.s32 4294967288, %v3235_v29  ;;  %v3247_v16 = vadd.s32 4294967280, %v3235_v29 }
 0x2c1   :  { %v3676_v9 = vpop.f32.mrf.mxu1  ;;  %3189 = vadd.xlane.f32.xlu0 %v3188_v40  ;;  %v5396_v47 = vshrl.u32 %v3234_v58, 7 }
 0x2c2   :  { %v3677_v31 = vadd.f32 %v3676_v9, %v3675_v37  ;;  %v3160_v28 = vmul.f32 %v5362_v34, %v3137_v0  ;;  %v3254_v37 = vadd.s32 4294967272, %v3235_v29  ;;  %v3261_v0 = vadd.s32 4294967264, %v3235_v29 }
 0x2c3   :  { %v3678_v43 = vpop.f32.mrf.mxu1  ;;  %v3268_v9 = vadd.s32 4294967256, %v3235_v29 }
 0x2c4   :  { %v3138_v21 = vmax.f32 %v3677_v31, 0.0  ;;  %v3191_v17 = vsel %vm3169_vm0, %v3160_v28, 0.0  ;;  %v3250_v31 = vsub.s32 %v3247_v16, %v5396_v47  ;;  %v3275_v28 = vadd.s32 4294967248, %v3235_v29 }
 0x2c5   :  { %v3679_v30 = vpop.f32.mrf.mxu1  ;;  %3192 = vadd.xlane.f32.xlu1 %v3191_v17  ;;  %v3257_v17 = vsub.s32 %v3254_v37, %v5396_v47 }
 0x2c6   :  { %v3680_v18 = vadd.f32 %v3679_v30, %v3678_v43  ;;  %v3161_v44 = vmul.f32 %v5362_v34, %v3138_v21  ;;  %v3238_v21 = vsub.s32 %v3235_v29, %v5396_v47  ;;  %v3282_v30 = vadd.s32 4294967240, %v3235_v29 }
 0x2c7   :  { %v3681_v12 = vpop.f32.mrf.mxu1 }
 0x2c8   :  { %v3139_v23 = vmax.f32 %v3680_v18, 0.0  ;;  %v3194_v4 = vsel %vm3169_vm0, %v3161_v44, 0.0  ;;  %v3264_v18 = vsub.s32 %v3261_v0, %v5396_v47  ;;  %v3289_v44 = vadd.s32 4294967232, %v3235_v29 }
 0x2c9   :  { %v3682_v25 = vpop.f32.mrf.mxu1  ;;  %3195 = vadd.xlane.f32.xlu0 %v3194_v4  ;;  %v3271_v4 = vsub.s32 %v3268_v9, %v5396_v47 }
 0x2ca   :  { %v3683_v39 = vadd.f32 %v3682_v25, %v3681_v12  ;;  %v3162_v32 = vmul.f32 %v5362_v34, %v3139_v23  ;;  %v3296_v25 = vadd.s32 4294967224, %v3235_v29 }
 0x2cb   :  { %v3684_v8 = vpop.f32.mrf.mxu1 }
 0x2cc   :  { %v3140_v35 = vmax.f32 %v3683_v39, 0.0  ;;  %v3197_v61 = vsel %vm3169_vm0, %v3162_v32, 0.0  ;;  %v3278_v32 = vsub.s32 %v3275_v28, %v5396_v47 }
 0x2cd   :  { %v3685_v45 = vpop.f32.mrf.mxu1  ;;  %3198 = vadd.xlane.f32.xlu1 %v3197_v61 }
 0x2ce   :  { %v3686_v19 = vadd.f32 %v3685_v45, %v3684_v8  ;;  %v3163_v49 = vmul.f32 %v5362_v34, %v3140_v35  ;;  %v3303_v35 = vadd.s32 4294967216, %v3235_v29 }
 0x2cf   :  { %v3687_v63 = vpop.f32.mrf.mxu1 }
 0x2d0   :  { %v3141_v7 = vmax.f32 %v3686_v19, 0.0  ;;  %v3200_v33 = vsel %vm3169_vm0, %v3163_v49, 0.0  ;;  %v3285_v19 = vsub.s32 %v3282_v30, %v5396_v47  ;;  %v3310_v49 = vadd.s32 4294967208, %v3235_v29 }
 0x2d1   :  { %v3688_v50 = vpop.f32.mrf.mxu1  ;;  %3201 = vadd.xlane.f32.xlu0 %v3200_v33 }
 0x2d2   :  { %v3689_v26 = vadd.f32 %v3688_v50, %v3687_v63  ;;  %v3164_v11 = vmul.f32 %v5362_v34, %v3141_v7  ;;  %v3292_v7 = vsub.s32 %v3289_v44, %v5396_v47  ;;  %v3317_v50 = vadd.s32 4294967200, %v3235_v29 }
 0x2d3   :  { %v3690_v24 = vpop.f32.mrf.mxu1 }
 0x2d4   :  { %v3142_v41 = vmax.f32 %v3689_v26, 0.0  ;;  %v3203_v36 = vsel %vm3169_vm0, %v3164_v11, 0.0 }
 0x2d5   :  { %v3691_v56 = vpop.f32.mrf.mxu1  ;;  %3204 = vadd.xlane.f32.xlu1 %v3203_v36 }
 0x2d6   :  { %v3692_v48 = vadd.f32 %v3691_v56, %v3690_v24  ;;  %v3165_v38 = vmul.f32 %v5362_v34, %v3142_v41  ;;  %v3299_v24 = vsub.s32 %v3296_v25, %v5396_v47  ;;  %v3324_v41 = vadd.s32 4294967192, %v3235_v29 }
 0x2d7   :  { %v3693_v13 = vpop.f32.mrf.mxu1 }
 0x2d8   :  { %v3143_v6 = vmax.f32 %v3692_v48, 0.0  ;;  %v3206_v55 = vsel %vm3169_vm0, %v3165_v38, 0.0  ;;  %v3306_v48 = vsub.s32 %v3303_v35, %v5396_v47 }
 0x2d9   :  { %3207 = vadd.xlane.f32.xlu0 %v3206_v55  ;;  %v3694_v2 = vpop.f32.mrf.mxu1 }
 0x2da   :  { %v3695_v20 = vadd.f32 %v3694_v2, %v3693_v13  ;;  %v3166_v1 = vmul.f32 %v5362_v34, %v3143_v6  ;;  %v3331_v13 = vadd.s32 4294967184, %v3235_v29  ;;  %v3313_v2 = vsub.s32 %v3310_v49, %v5396_v47 }
 0x2db   :  { %v3696_v62 = vpop.f32.mrf.mxu1 }
 0x2dc   :  { %v3144_v54 = vmax.f32 %v3695_v20, 0.0  ;;  %v3209_v22 = vsel %vm3169_vm0, %v3166_v1, 0.0 }
 0x2dd   :  { %3210 = vadd.xlane.f32.xlu1 %v3209_v22  ;;  %v3697_v53 = vpop.f32.mrf.mxu1 }
 0x2de   :  { %v3698_v51 = vadd.f32 %v3697_v53, %v3696_v62  ;;  %v3167_v14 = vmul.f32 %v5362_v34, %v3144_v54  ;;  %v3320_v62 = vsub.s32 %v3317_v50, %v5396_v47 }
 0x2e0   :  { %v3145_v46 = vmax.f32 %v3698_v51, 0.0  ;;  %v3212_v42 = vsel %vm3169_vm0, %v3167_v14, 0.0  ;;  %v3327_v51 = vsub.s32 %v3324_v41, %v5396_v47  ;;  %v3338_v14 = vadd.s32 4294967176, %v3235_v29 }
 0x2e1   :  { %3213 = vadd.xlane.f32.xlu0 %v3212_v42 }
 0x2e2   :  { %v3168_v15 = vmul.f32 %v5362_v34, %v3145_v46  ;;  %v3243_v34 = vsub.s32 %v3240_v52, %v5396_v47  ;;  %v3341_v29 = vsub.s32 %v3338_v14, %v5396_v47 }
 0x2e4   :  { %v3215_v3 = vsel %vm3169_vm0, %v3168_v15, 0.0 }
 0x2e5   :  { %3216 = vadd.xlane.f32.xlu1 %v3215_v3  ;;  %v3334_v3 = vsub.s32 %v3331_v13, %v5396_v47 }
 0x332   :  { %v3172_v5 = vpop.xlane.xlu0 %3171 }
 0x333   :  { %v3239_v61 = vrot.slane %v3172_v5, %v3238_v21 }
 0x336   :  { %v3175_v57 = vpop.xlane.xlu0 %3174 }
 0x337   :  { %v3244_v23 = vrot.slane %v3175_v57, %v3243_v34 }
 0x339   :  { %v3246_v26 = vsel %vm3245_vm1, %v3244_v23, %v3239_v61 }
 0x33a   :  { %v3178_v27 = vpop.xlane.xlu1 %3177 }
 0x33b   :  { %v3251_v39 = vrot.slane %v3178_v27, %v3250_v31 }
 0x33d   :  { %v3253_v36 = vsel %vm3252_vm2, %v3251_v39, %v3246_v26 }
 0x33e   :  { %v3181_v60 = vpop.xlane.xlu1 %3180 }
 0x33f   :  { %v3258_v45 = vrot.slane %v3181_v60, %v3257_v17 }
 0x341   :  { %v3260_v6 = vsel %vm3259_vm3, %v3258_v45, %v3253_v36 }
 0x342   :  { %v3184_v59 = vpop.xlane.xlu0 %3183 }
 0x343   :  { %v3265_v63 = vrot.slane %v3184_v59, %v3264_v18 }
 0x345   :  { %v3267_v20 = vsel %vm3266_vm4, %v3265_v63, %v3260_v6 }
 0x346   :  { %v3187_v10 = vpop.xlane.xlu1 %3186 }
 0x347   :  { %v3272_v11 = vrot.slane %v3187_v10, %v3271_v4 }
 0x349   :  { %v3274_v22 = vsel %vm3273_vm5, %v3272_v11, %v3267_v20 }
 0x34a   :  { %v3190_v40 = vpop.xlane.xlu0 %3189 }
 0x34b   :  { %v3279_v56 = vrot.slane %v3190_v40, %v3278_v32 }
 0x34d   :  { %v3281_v46 = vsel %vm3280_vm6, %v3279_v56, %v3274_v22 }
 0x34e   :  { %v3193_v43 = vpop.xlane.xlu1 %3192 }
 0x34f   :  { %v3286_v55 = vrot.slane %v3193_v43, %v3285_v19 }
 0x351   :  { %v3288_v5 = vsel %vm3287_vm7, %v3286_v55, %v3281_v46 }
 0x352   :  { %v3196_v12 = vpop.xlane.xlu0 %3195 }
 0x353   :  { %v3293_v1 = vrot.slane %v3196_v12, %v3292_v7 }
 0x355   :  { %v3295_v58 = vsel %vm3294_vm8, %v3293_v1, %v3288_v5 }
 0x356   :  { %v3199_v8 = vpop.xlane.xlu1 %3198 }
 0x357   :  { %v3300_v53 = vrot.slane %v3199_v8, %v3299_v24 }
 0x359   :  { %v3302_v59 = vsel %vm3301_vm9, %v3300_v53, %v3295_v58 }
 0x35a   :  { %v3202_v33 = vpop.xlane.xlu0 %3201 }
 0x35b   :  { %v3307_v42 = vrot.slane %v3202_v33, %v3306_v48 }
 0x35d   :  { %v3309_v16 = vsel %vm3308_vm10, %v3307_v42, %v3302_v59 }
 0x35e   :  { %v3205_v38 = vpop.xlane.xlu1 %3204 }
 0x35f   :  { %v3314_v27 = vrot.slane %v3205_v38, %v3313_v2 }
 0x361   :  { %v3316_v37 = vsel %vm3315_vm11, %v3314_v27, %v3309_v16 }
 0x362   :  { %v3208_v54 = vpop.xlane.xlu0 %3207 }
 0x363   :  { %v3321_v57 = vrot.slane %v3208_v54, %v3320_v62 }
 0x365   :  { %v3323_v0 = vsel %vm3322_vm12, %v3321_v57, %v3316_v37 }
 0x366   :  { %v3211_v15 = vpop.xlane.xlu1 %3210 }
 0x367   :  { %v3328_v52 = vrot.slane %v3211_v15, %v3327_v51 }
 0x369   :  { %v3330_v34 = vsel %vm3329_vm13, %v3328_v52, %v3323_v0 }
 0x36a   :  { %v3214_v60 = vpop.xlane.xlu0 %3213 }
 0x36b   :  { %v3335_v10 = vrot.slane %v3214_v60, %v3334_v3 }
 0x36d   :  { %v3337_v31 = vsel %vm3336_vm14, %v3335_v10, %v3330_v34 }
 0x36e   :  { %v3217_v40 = vpop.xlane.xlu1 %3216 }
 0x36f   :  { %v3342_v9 = vrot.slane %v3217_v40, %v3341_v29 }
 0x371   :  { %v3344_v28 = vsel %vm3343_vm15, %v3342_v9, %v3337_v31 }
 0x372   :  { %3346 = vst [vmem:[#allocation5] sm:$0x1] %v3344_v28 }
 0x373   :  { %4150 = shalt.err (!%p4147_p9)
}
 0x374   :  { %3356 = dma.vmem_to_hbm [thread:$0]  %s3354_s25, 16, %s5429_s4, [#allocation4]  }
 0x375   :  { %4161 = dma.done.wait [#allocation4], 16  }
 0x376   :  { %4162 = vsyncadd [#allocation4], 4294967280 }
 0x377   :  { %3360 = vsyncpa [#allocation3], 1 }
 0x378   :  { %3361 = vsyncpa [#allocation4], 1 }

</bundles_post_ra>
